<compile_context>
chip_gen: v5e
topology: v5e:2x2
jax: 0.10.0
libtpu: 0.0.40
codegen_flags: <defaults>
</compile_context>

<pallas_src>
import jax
import jax.numpy as jnp
from jax.experimental import pallas as pl
from jax.experimental.pallas import tpu as pltpu


def make_deeplog_kernel(num_layers, hidden_size, seq_len, batch_pad):
    L, H, T, Bp = num_layers, hidden_size, seq_len, batch_pad

    def kernel(*refs):
        x_ref, w_ih0_ref, w_hh_ref = refs[0:3]
        idx = 3
        if L > 1:
            w_ih_rest_ref = refs[idx]
            idx += 1
        small_ref, fc_w_ref, fc_b_ref, out_ref = refs[idx:idx + 4]

        # Hoisted per-lane affine turning sigmoid(2z) into tanh(z) on the
        # (pre-scaled) g-gate lanes, identity elsewhere.  Broadcast once.
        scale_b = jnp.broadcast_to(small_ref[L], (Bp, 4 * H))
        shift_b = jnp.broadcast_to(small_ref[L + 1], (Bp, 4 * H))

        # Per-layer weights / biases loaded once, reused every cell step.
        w_hh = [w_hh_ref[l] for l in range(L)]                     # (H, 4H) bf16
        if L > 1:
            w_ih = [None] + [w_ih_rest_ref[l] for l in range(L - 1)]
        else:
            w_ih = [None]
        bias = [small_ref[l] for l in range(L)]                    # (1, 4H) f32

        # Layer-0 input projection for ALL timesteps in one batched matmul
        # (bias folded).  x_ref is time-major: rows t*Bp:(t+1)*Bp = timestep t.
        xp0_all = jnp.dot(x_ref[...], w_ih0_ref[...],
                          preferred_element_type=jnp.float32) + bias[0]

        def cell(l, t, h_below, h_own, c_own):
            """One LSTM cell step for layer l at timestep t (f32 math)."""
            if l == 0:
                xp = xp0_all[t * Bp:(t + 1) * Bp, :]               # static slice
            else:
                xp = jnp.dot(h_below, w_ih[l],
                             preferred_element_type=jnp.float32) + bias[l]
            if t == 0:
                gates = xp                                         # h0 == 0
            else:
                gates = xp + jnp.dot(h_own, w_hh[l],
                                     preferred_element_type=jnp.float32)

            # One full-vreg sigmoid; g lanes fixed via tanh(z)=2*sigmoid(2z)-1.
            act = jax.nn.sigmoid(gates) * scale_b + shift_b
            i_g = act[:, 0 * H:1 * H]
            f_g = act[:, 1 * H:2 * H]
            g_g = act[:, 2 * H:3 * H]
            o_g = act[:, 3 * H:4 * H]

            c_new = i_g * g_g if t == 0 else f_g * c_own + i_g * g_g
            # h only ever feeds matmuls (recurrent / next layer / FC) -> keep bf16.
            h_new = (o_g * jnp.tanh(c_new)).astype(jnp.bfloat16)
            return h_new, c_new

        h = [None] * L     # bf16 hidden state of each layer (previous timestep)
        c = [None] * L     # f32 cell state of each layer

        # Wavefront over (layer, time): wave s runs layer l at t = s - l, so
        # the L per-layer chains overlap and the dependent path is T + L - 1.
        for s in range(T + L - 1):
            h_in = list(h)                      # values from the previous wave
            for l in range(L):
                t = s - l
                if 0 <= t < T:
                    h[l], c[l] = cell(l, t,
                                      h_in[l - 1] if l > 0 else None,
                                      h_in[l], c[l])

        # FC on the top layer's last-timestep hidden state; lane-dense output.
        out_ref[...] = (jnp.dot(h[L - 1], fc_w_ref[...],
                                preferred_element_type=jnp.float32)
                        + fc_b_ref[...])

    return kernel


def deeplog_forward(x_bti, lstm_params, fc_w, fc_b, hidden_size, num_layers):
    """x_bti: (B, T, input_size) float32, batch_first like PyTorch."""
    B, T, IN = x_bti.shape
    K = fc_w.shape[0]
    H, L = hidden_size, num_layers

    Bp = ((B + 7) // 8) * 8                      # full sublanes
    Kp = ((K + 127) // 128) * 128                # lane-dense output

    x = jnp.asarray(x_bti, jnp.float32)
    if Bp != B:
        x = jnp.pad(x, ((0, Bp - B), (0, 0), (0, 0)))
    # Wrapper-side time-major flatten: rows t*Bp:(t+1)*Bp hold timestep t.
    x_flat = jnp.transpose(x, (1, 0, 2)).reshape(T * Bp, IN).astype(jnp.bfloat16)

    # Pre-scale g-gate rows by 2 so tanh(z) = 2*sigmoid(2z) - 1 is recoverable
    # from a single full-width sigmoid inside the kernel.
    row_scale = jnp.ones((4 * H, 1), jnp.float32).at[2 * H:3 * H].set(2.0)

    w_ih0_t = None
    w_hh_list, w_ih_rest_list, b_list = [], [], []
    for l, (w_ih, w_hh, b_ih, b_hh) in enumerate(lstm_params):
        w_ih = jnp.asarray(w_ih, jnp.float32) * row_scale          # (4H, in_l)
        w_hh = jnp.asarray(w_hh, jnp.float32) * row_scale          # (4H, H)
        b = (jnp.asarray(b_ih, jnp.float32)
             + jnp.asarray(b_hh, jnp.float32)) * row_scale[:, 0]
        if l == 0:
            w_ih0_t = w_ih.T.astype(jnp.bfloat16)                  # (IN, 4H)
        else:
            w_ih_rest_list.append(w_ih.T.astype(jnp.bfloat16))     # (H, 4H)
        w_hh_list.append(w_hh.T.astype(jnp.bfloat16))              # (H, 4H)
        b_list.append(b.reshape(1, 4 * H))

    w_hh_all = jnp.stack(w_hh_list)                                # (L, H, 4H)

    gate_scale = jnp.ones((1, 4 * H), jnp.float32).at[:, 2 * H:3 * H].set(2.0)
    gate_shift = jnp.zeros((1, 4 * H), jnp.float32).at[:, 2 * H:3 * H].set(-1.0)
    # Biases (rows 0..L-1) + gate affine (rows L, L+1) in one small array.
    small = jnp.stack(b_list + [gate_scale, gate_shift])           # (L+2, 1, 4H)

    fc_w_t = jnp.zeros((H, Kp), jnp.float32).at[:, :K].set(
        jnp.asarray(fc_w, jnp.float32).T).astype(jnp.bfloat16)
    fc_b_p = jnp.zeros((1, Kp), jnp.float32).at[:, :K].set(
        jnp.asarray(fc_b, jnp.float32))

    inputs = [x_flat, w_ih0_t, w_hh_all]
    if L > 1:
        inputs.append(jnp.stack(w_ih_rest_list))                   # (L-1, H, 4H)
    inputs += [small, fc_w_t, fc_b_p]

    vmem = pl.BlockSpec(memory_space=pltpu.MemorySpace.VMEM)
    out = pl.pallas_call(
        make_deeplog_kernel(L, H, T, Bp),
        out_shape=jax.ShapeDtypeStruct((Bp, Kp), jnp.float32),
        in_specs=[vmem] * len(inputs),
        out_specs=vmem,
    )(*inputs)

    return out[:B, :K]


def ref_forward(x_bti, lstm_params, fc_w, fc_b, hidden_size, num_layers):
    """Pure-JAX f32 reference matching torch.nn.LSTM (gate order i,f,g,o)."""
    B, T, IN = x_bti.shape
    H = hidden_size
    h = [jnp.zeros((B, H), jnp.float32) for _ in range(num_layers)]
    c = [jnp.zeros((B, H), jnp.float32) for _ in range(num_layers)]
    inp = None
    for t in range(T):
        inp = x_bti[:, t, :]
        for l in range(num_layers):
            w_ih, w_hh, b_ih, b_hh = lstm_params[l]
            gates = inp @ w_ih.T + h[l] @ w_hh.T + b_ih + b_hh
            i_g = jax.nn.sigmoid(gates[:, 0 * H:1 * H])
            f_g = jax.nn.sigmoid(gates[:, 1 * H:2 * H])
            g_g = jnp.tanh(gates[:, 2 * H:3 * H])
            o_g = jax.nn.sigmoid(gates[:, 3 * H:4 * H])
            c[l] = f_g * c[l] + i_g * g_g
            h[l] = o_g * jnp.tanh(c[l])
            inp = h[l]
    return inp @ fc_w.T + fc_b


if __name__ == "__main__":
    # Small shapes consistent with deeplog's forward.
    B, T = 2, 8
    input_size, hidden_size, num_layers, num_keys = 8, 32, 2, 16

    key = jax.random.PRNGKey(0)
    keys = jax.random.split(key, 4 * num_layers + 3)

    # Deterministic synthetic parameters (shapes from nn.LSTM / nn.Linear).
    lstm_params = []
    kidx = 0
    for l in range(num_layers):
        in_l = input_size if l == 0 else hidden_size
        w_ih = 0.1 * jax.random.normal(keys[kidx], (4 * hidden_size, in_l),
                                       jnp.float32); kidx += 1
        w_hh = 0.1 * jax.random.normal(keys[kidx], (4 * hidden_size, hidden_size),
                                       jnp.float32); kidx += 1
        b_ih = 0.1 * jax.random.normal(keys[kidx], (4 * hidden_size,),
                                       jnp.float32); kidx += 1
        b_hh = 0.1 * jax.random.normal(keys[kidx], (4 * hidden_size,),
                                       jnp.float32); kidx += 1
        lstm_params.append((w_ih, w_hh, b_ih, b_hh))

    fc_w = 0.1 * jax.random.normal(keys[kidx], (num_keys, hidden_size),
                                   jnp.float32); kidx += 1
    fc_b = 0.1 * jax.random.normal(keys[kidx], (num_keys,),
                                   jnp.float32); kidx += 1

    # features[0] in the PyTorch forward -> the (B, T, input_size) tensor.
    x = jax.random.normal(keys[kidx], (B, T, input_size), jnp.float32)

    out = deeplog_forward(x, lstm_params, fc_w, fc_b,
                          hidden_size, num_layers)
    out = jax.block_until_ready(out)

    expected = ref_forward(x, lstm_params, fc_w, fc_b,
                           hidden_size, num_layers)

    assert out.shape == (B, num_keys)
    # Tolerance relaxed vs. the f32 reference: MXU operands are bf16
    # (accumulation stays f32, elementwise gate math stays f32).
    assert jnp.allclose(out, expected, rtol=2e-2, atol=2e-2), (
        "Pallas output mismatch vs JAX reference")

    print("KERNEL_OK")
</pallas_src>

<mosaic_0001>
module attributes {stable_mosaic.version = 11 : i64} {
  func.func @kernel(%arg0: memref<64x8xbf16, #tpu.memory_space<vmem>>, %arg1: memref<8x128xbf16, #tpu.memory_space<vmem>>, %arg2: memref<2x32x128xbf16, #tpu.memory_space<vmem>>, %arg3: memref<1x32x128xbf16, #tpu.memory_space<vmem>>, %arg4: memref<4x1x128xf32, #tpu.memory_space<vmem>>, %arg5: memref<32x128xbf16, #tpu.memory_space<vmem>>, %arg6: memref<1x128xf32, #tpu.memory_space<vmem>>, %arg7: memref<8x128xf32, #tpu.memory_space<vmem>>) attributes {dimension_semantics = [], scalar_prefetch = 0 : i64, scratch_operands = 0 : i64, tpu.core_type = #tpu.core_type<tc>} {
    %c2 = arith.constant 2 : index
    %c0 = arith.constant 0 : index
    %c0_0 = arith.constant 0 : index
    %0 = vector.load %arg4[%c2, %c0, %c0_0] : memref<4x1x128xf32, #tpu.memory_space<vmem>>, vector<1x1x128xf32>
    %1 = vector.shape_cast %0 : vector<1x1x128xf32> to vector<1x128xf32>
    %2 = vector.shape_cast %1 : vector<1x128xf32> to vector<1x128xf32>
    %3 = vector.broadcast %2 : vector<1x128xf32> to vector<8x128xf32>
    %c3 = arith.constant 3 : index
    %c0_1 = arith.constant 0 : index
    %c0_2 = arith.constant 0 : index
    %4 = vector.load %arg4[%c3, %c0_1, %c0_2] : memref<4x1x128xf32, #tpu.memory_space<vmem>>, vector<1x1x128xf32>
    %5 = vector.shape_cast %4 : vector<1x1x128xf32> to vector<1x128xf32>
    %6 = vector.shape_cast %5 : vector<1x128xf32> to vector<1x128xf32>
    %7 = vector.broadcast %6 : vector<1x128xf32> to vector<8x128xf32>
    %c0_3 = arith.constant 0 : index
    %c0_4 = arith.constant 0 : index
    %c0_5 = arith.constant 0 : index
    %8 = vector.load %arg2[%c0_3, %c0_4, %c0_5] : memref<2x32x128xbf16, #tpu.memory_space<vmem>>, vector<1x32x128xbf16>
    %9 = vector.shape_cast %8 : vector<1x32x128xbf16> to vector<32x128xbf16>
    %c1 = arith.constant 1 : index
    %c0_6 = arith.constant 0 : index
    %c0_7 = arith.constant 0 : index
    %10 = vector.load %arg2[%c1, %c0_6, %c0_7] : memref<2x32x128xbf16, #tpu.memory_space<vmem>>, vector<1x32x128xbf16>
    %11 = vector.shape_cast %10 : vector<1x32x128xbf16> to vector<32x128xbf16>
    %c0_8 = arith.constant 0 : index
    %c0_9 = arith.constant 0 : index
    %c0_10 = arith.constant 0 : index
    %12 = vector.load %arg3[%c0_8, %c0_9, %c0_10] : memref<1x32x128xbf16, #tpu.memory_space<vmem>>, vector<1x32x128xbf16>
    %13 = vector.shape_cast %12 : vector<1x32x128xbf16> to vector<32x128xbf16>
    %c0_11 = arith.constant 0 : index
    %c0_12 = arith.constant 0 : index
    %c0_13 = arith.constant 0 : index
    %14 = vector.load %arg4[%c0_11, %c0_12, %c0_13] : memref<4x1x128xf32, #tpu.memory_space<vmem>>, vector<1x1x128xf32>
    %15 = vector.shape_cast %14 : vector<1x1x128xf32> to vector<1x128xf32>
    %c1_14 = arith.constant 1 : index
    %c0_15 = arith.constant 0 : index
    %c0_16 = arith.constant 0 : index
    %16 = vector.load %arg4[%c1_14, %c0_15, %c0_16] : memref<4x1x128xf32, #tpu.memory_space<vmem>>, vector<1x1x128xf32>
    %17 = vector.shape_cast %16 : vector<1x1x128xf32> to vector<1x128xf32>
    %c0_17 = arith.constant 0 : index
    %c0_18 = arith.constant 0 : index
    %18 = vector.load %arg0[%c0_17, %c0_18] : memref<64x8xbf16, #tpu.memory_space<vmem>>, vector<64x8xbf16>
    %c0_19 = arith.constant 0 : index
    %c0_20 = arith.constant 0 : index
    %19 = vector.load %arg1[%c0_19, %c0_20] : memref<8x128xbf16, #tpu.memory_space<vmem>>, vector<8x128xbf16>
    %cst = arith.constant dense<0.000000e+00> : vector<64x128xf32>
    %20 = tpu.matmul %18, %19, %cst {dimension_numbers = #tpu.dot_dimension_numbers<[1], [0], [0], [1], [0, 0, 1, 1], [], []>} : vector<64x8xbf16>, vector<8x128xbf16>, vector<64x128xf32> -> vector<64x128xf32>
    %21 = vector.broadcast %15 : vector<1x128xf32> to vector<64x128xf32>
    %22 = arith.addf %20, %21 : vector<64x128xf32>
    %23 = vector.extract_strided_slice %22 {offsets = [0, 0], sizes = [8, 128], strides = [1, 1]} : vector<64x128xf32> to vector<8x128xf32>
    %24 = arith.negf %23 : vector<8x128xf32>
    %25 = math.exp %24 : vector<8x128xf32>
    %cst_21 = arith.constant 1.000000e+00 : f32
    %26 = vector.broadcast %cst_21 : f32 to vector<8x128xf32>
    %27 = arith.addf %26, %25 : vector<8x128xf32>
    %28 = arith.divf %26, %27 : vector<8x128xf32>
    %29 = arith.mulf %28, %3 : vector<8x128xf32>
    %30 = arith.addf %29, %7 : vector<8x128xf32>
    %31 = vector.extract_strided_slice %30 {offsets = [0, 0], sizes = [8, 32], strides = [1, 1]} : vector<8x128xf32> to vector<8x32xf32>
    %32 = vector.extract_strided_slice %30 {offsets = [0, 64], sizes = [8, 32], strides = [1, 1]} : vector<8x128xf32> to vector<8x32xf32>
    %33 = vector.extract_strided_slice %30 {offsets = [0, 96], sizes = [8, 32], strides = [1, 1]} : vector<8x128xf32> to vector<8x32xf32>
    %34 = arith.mulf %31, %32 : vector<8x32xf32>
    %35 = math.tanh %34 : vector<8x32xf32>
    %36 = arith.mulf %33, %35 : vector<8x32xf32>
    %37 = arith.truncf %36 : vector<8x32xf32> to vector<8x32xbf16>
    %38 = vector.extract_strided_slice %22 {offsets = [8, 0], sizes = [8, 128], strides = [1, 1]} : vector<64x128xf32> to vector<8x128xf32>
    %cst_22 = arith.constant dense<0.000000e+00> : vector<8x128xf32>
    %39 = tpu.matmul %37, %9, %cst_22 {dimension_numbers = #tpu.dot_dimension_numbers<[1], [0], [0], [1], [0, 0, 1, 1], [], []>} : vector<8x32xbf16>, vector<32x128xbf16>, vector<8x128xf32> -> vector<8x128xf32>
    %40 = arith.addf %38, %39 : vector<8x128xf32>
    %41 = arith.negf %40 : vector<8x128xf32>
    %42 = math.exp %41 : vector<8x128xf32>
    %cst_23 = arith.constant 1.000000e+00 : f32
    %43 = vector.broadcast %cst_23 : f32 to vector<8x128xf32>
    %44 = arith.addf %43, %42 : vector<8x128xf32>
    %45 = arith.divf %43, %44 : vector<8x128xf32>
    %46 = arith.mulf %45, %3 : vector<8x128xf32>
    %47 = arith.addf %46, %7 : vector<8x128xf32>
    %48 = vector.extract_strided_slice %47 {offsets = [0, 0], sizes = [8, 32], strides = [1, 1]} : vector<8x128xf32> to vector<8x32xf32>
    %49 = vector.extract_strided_slice %47 {offsets = [0, 32], sizes = [8, 32], strides = [1, 1]} : vector<8x128xf32> to vector<8x32xf32>
    %50 = vector.extract_strided_slice %47 {offsets = [0, 64], sizes = [8, 32], strides = [1, 1]} : vector<8x128xf32> to vector<8x32xf32>
    %51 = vector.extract_strided_slice %47 {offsets = [0, 96], sizes = [8, 32], strides = [1, 1]} : vector<8x128xf32> to vector<8x32xf32>
    %52 = arith.mulf %49, %34 : vector<8x32xf32>
    %53 = arith.mulf %48, %50 : vector<8x32xf32>
    %54 = arith.addf %52, %53 : vector<8x32xf32>
    %55 = math.tanh %54 : vector<8x32xf32>
    %56 = arith.mulf %51, %55 : vector<8x32xf32>
    %57 = arith.truncf %56 : vector<8x32xf32> to vector<8x32xbf16>
    %cst_24 = arith.constant dense<0.000000e+00> : vector<8x128xf32>
    %58 = tpu.matmul %37, %13, %cst_24 {dimension_numbers = #tpu.dot_dimension_numbers<[1], [0], [0], [1], [0, 0, 1, 1], [], []>} : vector<8x32xbf16>, vector<32x128xbf16>, vector<8x128xf32> -> vector<8x128xf32>
    %59 = vector.broadcast %17 : vector<1x128xf32> to vector<8x128xf32>
    %60 = arith.addf %58, %59 : vector<8x128xf32>
    %61 = arith.negf %60 : vector<8x128xf32>
    %62 = math.exp %61 : vector<8x128xf32>
    %cst_25 = arith.constant 1.000000e+00 : f32
    %63 = vector.broadcast %cst_25 : f32 to vector<8x128xf32>
    %64 = arith.addf %63, %62 : vector<8x128xf32>
    %65 = arith.divf %63, %64 : vector<8x128xf32>
    %66 = arith.mulf %65, %3 : vector<8x128xf32>
    %67 = arith.addf %66, %7 : vector<8x128xf32>
    %68 = vector.extract_strided_slice %67 {offsets = [0, 0], sizes = [8, 32], strides = [1, 1]} : vector<8x128xf32> to vector<8x32xf32>
    %69 = vector.extract_strided_slice %67 {offsets = [0, 64], sizes = [8, 32], strides = [1, 1]} : vector<8x128xf32> to vector<8x32xf32>
    %70 = vector.extract_strided_slice %67 {offsets = [0, 96], sizes = [8, 32], strides = [1, 1]} : vector<8x128xf32> to vector<8x32xf32>
    %71 = arith.mulf %68, %69 : vector<8x32xf32>
    %72 = math.tanh %71 : vector<8x32xf32>
    %73 = arith.mulf %70, %72 : vector<8x32xf32>
    %74 = arith.truncf %73 : vector<8x32xf32> to vector<8x32xbf16>
    %75 = vector.extract_strided_slice %22 {offsets = [16, 0], sizes = [8, 128], strides = [1, 1]} : vector<64x128xf32> to vector<8x128xf32>
    %cst_26 = arith.constant dense<0.000000e+00> : vector<8x128xf32>
    %76 = tpu.matmul %57, %9, %cst_26 {dimension_numbers = #tpu.dot_dimension_numbers<[1], [0], [0], [1], [0, 0, 1, 1], [], []>} : vector<8x32xbf16>, vector<32x128xbf16>, vector<8x128xf32> -> vector<8x128xf32>
    %77 = arith.addf %75, %76 : vector<8x128xf32>
    %78 = arith.negf %77 : vector<8x128xf32>
    %79 = math.exp %78 : vector<8x128xf32>
    %cst_27 = arith.constant 1.000000e+00 : f32
    %80 = vector.broadcast %cst_27 : f32 to vector<8x128xf32>
    %81 = arith.addf %80, %79 : vector<8x128xf32>
    %82 = arith.divf %80, %81 : vector<8x128xf32>
    %83 = arith.mulf %82, %3 : vector<8x128xf32>
    %84 = arith.addf %83, %7 : vector<8x128xf32>
    %85 = vector.extract_strided_slice %84 {offsets = [0, 0], sizes = [8, 32], strides = [1, 1]} : vector<8x128xf32> to vector<8x32xf32>
    %86 = vector.extract_strided_slice %84 {offsets = [0, 32], sizes = [8, 32], strides = [1, 1]} : vector<8x128xf32> to vector<8x32xf32>
    %87 = vector.extract_strided_slice %84 {offsets = [0, 64], sizes = [8, 32], strides = [1, 1]} : vector<8x128xf32> to vector<8x32xf32>
    %88 = vector.extract_strided_slice %84 {offsets = [0, 96], sizes = [8, 32], strides = [1, 1]} : vector<8x128xf32> to vector<8x32xf32>
    %89 = arith.mulf %86, %54 : vector<8x32xf32>
    %90 = arith.mulf %85, %87 : vector<8x32xf32>
    %91 = arith.addf %89, %90 : vector<8x32xf32>
    %92 = math.tanh %91 : vector<8x32xf32>
    %93 = arith.mulf %88, %92 : vector<8x32xf32>
    %94 = arith.truncf %93 : vector<8x32xf32> to vector<8x32xbf16>
    %cst_28 = arith.constant dense<0.000000e+00> : vector<8x128xf32>
    %95 = tpu.matmul %57, %13, %cst_28 {dimension_numbers = #tpu.dot_dimension_numbers<[1], [0], [0], [1], [0, 0, 1, 1], [], []>} : vector<8x32xbf16>, vector<32x128xbf16>, vector<8x128xf32> -> vector<8x128xf32>
    %96 = vector.broadcast %17 : vector<1x128xf32> to vector<8x128xf32>
    %97 = arith.addf %95, %96 : vector<8x128xf32>
    %cst_29 = arith.constant dense<0.000000e+00> : vector<8x128xf32>
    %98 = tpu.matmul %74, %11, %cst_29 {dimension_numbers = #tpu.dot_dimension_numbers<[1], [0], [0], [1], [0, 0, 1, 1], [], []>} : vector<8x32xbf16>, vector<32x128xbf16>, vector<8x128xf32> -> vector<8x128xf32>
    %99 = arith.addf %97, %98 : vector<8x128xf32>
    %100 = arith.negf %99 : vector<8x128xf32>
    %101 = math.exp %100 : vector<8x128xf32>
    %cst_30 = arith.constant 1.000000e+00 : f32
    %102 = vector.broadcast %cst_30 : f32 to vector<8x128xf32>
    %103 = arith.addf %102, %101 : vector<8x128xf32>
    %104 = arith.divf %102, %103 : vector<8x128xf32>
    %105 = arith.mulf %104, %3 : vector<8x128xf32>
    %106 = arith.addf %105, %7 : vector<8x128xf32>
    %107 = vector.extract_strided_slice %106 {offsets = [0, 0], sizes = [8, 32], strides = [1, 1]} : vector<8x128xf32> to vector<8x32xf32>
    %108 = vector.extract_strided_slice %106 {offsets = [0, 32], sizes = [8, 32], strides = [1, 1]} : vector<8x128xf32> to vector<8x32xf32>
    %109 = vector.extract_strided_slice %106 {offsets = [0, 64], sizes = [8, 32], strides = [1, 1]} : vector<8x128xf32> to vector<8x32xf32>
    %110 = vector.extract_strided_slice %106 {offsets = [0, 96], sizes = [8, 32], strides = [1, 1]} : vector<8x128xf32> to vector<8x32xf32>
    %111 = arith.mulf %108, %71 : vector<8x32xf32>
    %112 = arith.mulf %107, %109 : vector<8x32xf32>
    %113 = arith.addf %111, %112 : vector<8x32xf32>
    %114 = math.tanh %113 : vector<8x32xf32>
    %115 = arith.mulf %110, %114 : vector<8x32xf32>
    %116 = arith.truncf %115 : vector<8x32xf32> to vector<8x32xbf16>
    %117 = vector.extract_strided_slice %22 {offsets = [24, 0], sizes = [8, 128], strides = [1, 1]} : vector<64x128xf32> to vector<8x128xf32>
    %cst_31 = arith.constant dense<0.000000e+00> : vector<8x128xf32>
    %118 = tpu.matmul %94, %9, %cst_31 {dimension_numbers = #tpu.dot_dimension_numbers<[1], [0], [0], [1], [0, 0, 1, 1], [], []>} : vector<8x32xbf16>, vector<32x128xbf16>, vector<8x128xf32> -> vector<8x128xf32>
    %119 = arith.addf %117, %118 : vector<8x128xf32>
    %120 = arith.negf %119 : vector<8x128xf32>
    %121 = math.exp %120 : vector<8x128xf32>
    %cst_32 = arith.constant 1.000000e+00 : f32
    %122 = vector.broadcast %cst_32 : f32 to vector<8x128xf32>
    %123 = arith.addf %122, %121 : vector<8x128xf32>
    %124 = arith.divf %122, %123 : vector<8x128xf32>
    %125 = arith.mulf %124, %3 : vector<8x128xf32>
    %126 = arith.addf %125, %7 : vector<8x128xf32>
    %127 = vector.extract_strided_slice %126 {offsets = [0, 0], sizes = [8, 32], strides = [1, 1]} : vector<8x128xf32> to vector<8x32xf32>
    %128 = vector.extract_strided_slice %126 {offsets = [0, 32], sizes = [8, 32], strides = [1, 1]} : vector<8x128xf32> to vector<8x32xf32>
    %129 = vector.extract_strided_slice %126 {offsets = [0, 64], sizes = [8, 32], strides = [1, 1]} : vector<8x128xf32> to vector<8x32xf32>
    %130 = vector.extract_strided_slice %126 {offsets = [0, 96], sizes = [8, 32], strides = [1, 1]} : vector<8x128xf32> to vector<8x32xf32>
    %131 = arith.mulf %128, %91 : vector<8x32xf32>
    %132 = arith.mulf %127, %129 : vector<8x32xf32>
    %133 = arith.addf %131, %132 : vector<8x32xf32>
    %134 = math.tanh %133 : vector<8x32xf32>
    %135 = arith.mulf %130, %134 : vector<8x32xf32>
    %136 = arith.truncf %135 : vector<8x32xf32> to vector<8x32xbf16>
    %cst_33 = arith.constant dense<0.000000e+00> : vector<8x128xf32>
    %137 = tpu.matmul %94, %13, %cst_33 {dimension_numbers = #tpu.dot_dimension_numbers<[1], [0], [0], [1], [0, 0, 1, 1], [], []>} : vector<8x32xbf16>, vector<32x128xbf16>, vector<8x128xf32> -> vector<8x128xf32>
    %138 = vector.broadcast %17 : vector<1x128xf32> to vector<8x128xf32>
    %139 = arith.addf %137, %138 : vector<8x128xf32>
    %cst_34 = arith.constant dense<0.000000e+00> : vector<8x128xf32>
    %140 = tpu.matmul %116, %11, %cst_34 {dimension_numbers = #tpu.dot_dimension_numbers<[1], [0], [0], [1], [0, 0, 1, 1], [], []>} : vector<8x32xbf16>, vector<32x128xbf16>, vector<8x128xf32> -> vector<8x128xf32>
    %141 = arith.addf %139, %140 : vector<8x128xf32>
    %142 = arith.negf %141 : vector<8x128xf32>
    %143 = math.exp %142 : vector<8x128xf32>
    %cst_35 = arith.constant 1.000000e+00 : f32
    %144 = vector.broadcast %cst_35 : f32 to vector<8x128xf32>
    %145 = arith.addf %144, %143 : vector<8x128xf32>
    %146 = arith.divf %144, %145 : vector<8x128xf32>
    %147 = arith.mulf %146, %3 : vector<8x128xf32>
    %148 = arith.addf %147, %7 : vector<8x128xf32>
    %149 = vector.extract_strided_slice %148 {offsets = [0, 0], sizes = [8, 32], strides = [1, 1]} : vector<8x128xf32> to vector<8x32xf32>
    %150 = vector.extract_strided_slice %148 {offsets = [0, 32], sizes = [8, 32], strides = [1, 1]} : vector<8x128xf32> to vector<8x32xf32>
    %151 = vector.extract_strided_slice %148 {offsets = [0, 64], sizes = [8, 32], strides = [1, 1]} : vector<8x128xf32> to vector<8x32xf32>
    %152 = vector.extract_strided_slice %148 {offsets = [0, 96], sizes = [8, 32], strides = [1, 1]} : vector<8x128xf32> to vector<8x32xf32>
    %153 = arith.mulf %150, %113 : vector<8x32xf32>
    %154 = arith.mulf %149, %151 : vector<8x32xf32>
    %155 = arith.addf %153, %154 : vector<8x32xf32>
    %156 = math.tanh %155 : vector<8x32xf32>
    %157 = arith.mulf %152, %156 : vector<8x32xf32>
    %158 = arith.truncf %157 : vector<8x32xf32> to vector<8x32xbf16>
    %159 = vector.extract_strided_slice %22 {offsets = [32, 0], sizes = [8, 128], strides = [1, 1]} : vector<64x128xf32> to vector<8x128xf32>
    %cst_36 = arith.constant dense<0.000000e+00> : vector<8x128xf32>
    %160 = tpu.matmul %136, %9, %cst_36 {dimension_numbers = #tpu.dot_dimension_numbers<[1], [0], [0], [1], [0, 0, 1, 1], [], []>} : vector<8x32xbf16>, vector<32x128xbf16>, vector<8x128xf32> -> vector<8x128xf32>
    %161 = arith.addf %159, %160 : vector<8x128xf32>
    %162 = arith.negf %161 : vector<8x128xf32>
    %163 = math.exp %162 : vector<8x128xf32>
    %cst_37 = arith.constant 1.000000e+00 : f32
    %164 = vector.broadcast %cst_37 : f32 to vector<8x128xf32>
    %165 = arith.addf %164, %163 : vector<8x128xf32>
    %166 = arith.divf %164, %165 : vector<8x128xf32>
    %167 = arith.mulf %166, %3 : vector<8x128xf32>
    %168 = arith.addf %167, %7 : vector<8x128xf32>
    %169 = vector.extract_strided_slice %168 {offsets = [0, 0], sizes = [8, 32], strides = [1, 1]} : vector<8x128xf32> to vector<8x32xf32>
    %170 = vector.extract_strided_slice %168 {offsets = [0, 32], sizes = [8, 32], strides = [1, 1]} : vector<8x128xf32> to vector<8x32xf32>
    %171 = vector.extract_strided_slice %168 {offsets = [0, 64], sizes = [8, 32], strides = [1, 1]} : vector<8x128xf32> to vector<8x32xf32>
    %172 = vector.extract_strided_slice %168 {offsets = [0, 96], sizes = [8, 32], strides = [1, 1]} : vector<8x128xf32> to vector<8x32xf32>
    %173 = arith.mulf %170, %133 : vector<8x32xf32>
    %174 = arith.mulf %169, %171 : vector<8x32xf32>
    %175 = arith.addf %173, %174 : vector<8x32xf32>
    %176 = math.tanh %175 : vector<8x32xf32>
    %177 = arith.mulf %172, %176 : vector<8x32xf32>
    %178 = arith.truncf %177 : vector<8x32xf32> to vector<8x32xbf16>
    %cst_38 = arith.constant dense<0.000000e+00> : vector<8x128xf32>
    %179 = tpu.matmul %136, %13, %cst_38 {dimension_numbers = #tpu.dot_dimension_numbers<[1], [0], [0], [1], [0, 0, 1, 1], [], []>} : vector<8x32xbf16>, vector<32x128xbf16>, vector<8x128xf32> -> vector<8x128xf32>
    %180 = vector.broadcast %17 : vector<1x128xf32> to vector<8x128xf32>
    %181 = arith.addf %179, %180 : vector<8x128xf32>
    %cst_39 = arith.constant dense<0.000000e+00> : vector<8x128xf32>
    %182 = tpu.matmul %158, %11, %cst_39 {dimension_numbers = #tpu.dot_dimension_numbers<[1], [0], [0], [1], [0, 0, 1, 1], [], []>} : vector<8x32xbf16>, vector<32x128xbf16>, vector<8x128xf32> -> vector<8x128xf32>
    %183 = arith.addf %181, %182 : vector<8x128xf32>
    %184 = arith.negf %183 : vector<8x128xf32>
    %185 = math.exp %184 : vector<8x128xf32>
    %cst_40 = arith.constant 1.000000e+00 : f32
    %186 = vector.broadcast %cst_40 : f32 to vector<8x128xf32>
    %187 = arith.addf %186, %185 : vector<8x128xf32>
    %188 = arith.divf %186, %187 : vector<8x128xf32>
    %189 = arith.mulf %188, %3 : vector<8x128xf32>
    %190 = arith.addf %189, %7 : vector<8x128xf32>
    %191 = vector.extract_strided_slice %190 {offsets = [0, 0], sizes = [8, 32], strides = [1, 1]} : vector<8x128xf32> to vector<8x32xf32>
    %192 = vector.extract_strided_slice %190 {offsets = [0, 32], sizes = [8, 32], strides = [1, 1]} : vector<8x128xf32> to vector<8x32xf32>
    %193 = vector.extract_strided_slice %190 {offsets = [0, 64], sizes = [8, 32], strides = [1, 1]} : vector<8x128xf32> to vector<8x32xf32>
    %194 = vector.extract_strided_slice %190 {offsets = [0, 96], sizes = [8, 32], strides = [1, 1]} : vector<8x128xf32> to vector<8x32xf32>
    %195 = arith.mulf %192, %155 : vector<8x32xf32>
    %196 = arith.mulf %191, %193 : vector<8x32xf32>
    %197 = arith.addf %195, %196 : vector<8x32xf32>
    %198 = math.tanh %197 : vector<8x32xf32>
    %199 = arith.mulf %194, %198 : vector<8x32xf32>
    %200 = arith.truncf %199 : vector<8x32xf32> to vector<8x32xbf16>
    %201 = vector.extract_strided_slice %22 {offsets = [40, 0], sizes = [8, 128], strides = [1, 1]} : vector<64x128xf32> to vector<8x128xf32>
    %cst_41 = arith.constant dense<0.000000e+00> : vector<8x128xf32>
    %202 = tpu.matmul %178, %9, %cst_41 {dimension_numbers = #tpu.dot_dimension_numbers<[1], [0], [0], [1], [0, 0, 1, 1], [], []>} : vector<8x32xbf16>, vector<32x128xbf16>, vector<8x128xf32> -> vector<8x128xf32>
    %203 = arith.addf %201, %202 : vector<8x128xf32>
    %204 = arith.negf %203 : vector<8x128xf32>
    %205 = math.exp %204 : vector<8x128xf32>
    %cst_42 = arith.constant 1.000000e+00 : f32
    %206 = vector.broadcast %cst_42 : f32 to vector<8x128xf32>
    %207 = arith.addf %206, %205 : vector<8x128xf32>
    %208 = arith.divf %206, %207 : vector<8x128xf32>
    %209 = arith.mulf %208, %3 : vector<8x128xf32>
    %210 = arith.addf %209, %7 : vector<8x128xf32>
    %211 = vector.extract_strided_slice %210 {offsets = [0, 0], sizes = [8, 32], strides = [1, 1]} : vector<8x128xf32> to vector<8x32xf32>
    %212 = vector.extract_strided_slice %210 {offsets = [0, 32], sizes = [8, 32], strides = [1, 1]} : vector<8x128xf32> to vector<8x32xf32>
    %213 = vector.extract_strided_slice %210 {offsets = [0, 64], sizes = [8, 32], strides = [1, 1]} : vector<8x128xf32> to vector<8x32xf32>
    %214 = vector.extract_strided_slice %210 {offsets = [0, 96], sizes = [8, 32], strides = [1, 1]} : vector<8x128xf32> to vector<8x32xf32>
    %215 = arith.mulf %212, %175 : vector<8x32xf32>
    %216 = arith.mulf %211, %213 : vector<8x32xf32>
    %217 = arith.addf %215, %216 : vector<8x32xf32>
    %218 = math.tanh %217 : vector<8x32xf32>
    %219 = arith.mulf %214, %218 : vector<8x32xf32>
    %220 = arith.truncf %219 : vector<8x32xf32> to vector<8x32xbf16>
    %cst_43 = arith.constant dense<0.000000e+00> : vector<8x128xf32>
    %221 = tpu.matmul %178, %13, %cst_43 {dimension_numbers = #tpu.dot_dimension_numbers<[1], [0], [0], [1], [0, 0, 1, 1], [], []>} : vector<8x32xbf16>, vector<32x128xbf16>, vector<8x128xf32> -> vector<8x128xf32>
    %222 = vector.broadcast %17 : vector<1x128xf32> to vector<8x128xf32>
    %223 = arith.addf %221, %222 : vector<8x128xf32>
    %cst_44 = arith.constant dense<0.000000e+00> : vector<8x128xf32>
    %224 = tpu.matmul %200, %11, %cst_44 {dimension_numbers = #tpu.dot_dimension_numbers<[1], [0], [0], [1], [0, 0, 1, 1], [], []>} : vector<8x32xbf16>, vector<32x128xbf16>, vector<8x128xf32> -> vector<8x128xf32>
    %225 = arith.addf %223, %224 : vector<8x128xf32>
    %226 = arith.negf %225 : vector<8x128xf32>
    %227 = math.exp %226 : vector<8x128xf32>
    %cst_45 = arith.constant 1.000000e+00 : f32
    %228 = vector.broadcast %cst_45 : f32 to vector<8x128xf32>
    %229 = arith.addf %228, %227 : vector<8x128xf32>
    %230 = arith.divf %228, %229 : vector<8x128xf32>
    %231 = arith.mulf %230, %3 : vector<8x128xf32>
    %232 = arith.addf %231, %7 : vector<8x128xf32>
    %233 = vector.extract_strided_slice %232 {offsets = [0, 0], sizes = [8, 32], strides = [1, 1]} : vector<8x128xf32> to vector<8x32xf32>
    %234 = vector.extract_strided_slice %232 {offsets = [0, 32], sizes = [8, 32], strides = [1, 1]} : vector<8x128xf32> to vector<8x32xf32>
    %235 = vector.extract_strided_slice %232 {offsets = [0, 64], sizes = [8, 32], strides = [1, 1]} : vector<8x128xf32> to vector<8x32xf32>
    %236 = vector.extract_strided_slice %232 {offsets = [0, 96], sizes = [8, 32], strides = [1, 1]} : vector<8x128xf32> to vector<8x32xf32>
    %237 = arith.mulf %234, %197 : vector<8x32xf32>
    %238 = arith.mulf %233, %235 : vector<8x32xf32>
    %239 = arith.addf %237, %238 : vector<8x32xf32>
    %240 = math.tanh %239 : vector<8x32xf32>
    %241 = arith.mulf %236, %240 : vector<8x32xf32>
    %242 = arith.truncf %241 : vector<8x32xf32> to vector<8x32xbf16>
    %243 = vector.extract_strided_slice %22 {offsets = [48, 0], sizes = [8, 128], strides = [1, 1]} : vector<64x128xf32> to vector<8x128xf32>
    %cst_46 = arith.constant dense<0.000000e+00> : vector<8x128xf32>
    %244 = tpu.matmul %220, %9, %cst_46 {dimension_numbers = #tpu.dot_dimension_numbers<[1], [0], [0], [1], [0, 0, 1, 1], [], []>} : vector<8x32xbf16>, vector<32x128xbf16>, vector<8x128xf32> -> vector<8x128xf32>
    %245 = arith.addf %243, %244 : vector<8x128xf32>
    %246 = arith.negf %245 : vector<8x128xf32>
    %247 = math.exp %246 : vector<8x128xf32>
    %cst_47 = arith.constant 1.000000e+00 : f32
    %248 = vector.broadcast %cst_47 : f32 to vector<8x128xf32>
    %249 = arith.addf %248, %247 : vector<8x128xf32>
    %250 = arith.divf %248, %249 : vector<8x128xf32>
    %251 = arith.mulf %250, %3 : vector<8x128xf32>
    %252 = arith.addf %251, %7 : vector<8x128xf32>
    %253 = vector.extract_strided_slice %252 {offsets = [0, 0], sizes = [8, 32], strides = [1, 1]} : vector<8x128xf32> to vector<8x32xf32>
    %254 = vector.extract_strided_slice %252 {offsets = [0, 32], sizes = [8, 32], strides = [1, 1]} : vector<8x128xf32> to vector<8x32xf32>
    %255 = vector.extract_strided_slice %252 {offsets = [0, 64], sizes = [8, 32], strides = [1, 1]} : vector<8x128xf32> to vector<8x32xf32>
    %256 = vector.extract_strided_slice %252 {offsets = [0, 96], sizes = [8, 32], strides = [1, 1]} : vector<8x128xf32> to vector<8x32xf32>
    %257 = arith.mulf %254, %217 : vector<8x32xf32>
    %258 = arith.mulf %253, %255 : vector<8x32xf32>
    %259 = arith.addf %257, %258 : vector<8x32xf32>
    %260 = math.tanh %259 : vector<8x32xf32>
    %261 = arith.mulf %256, %260 : vector<8x32xf32>
    %262 = arith.truncf %261 : vector<8x32xf32> to vector<8x32xbf16>
    %cst_48 = arith.constant dense<0.000000e+00> : vector<8x128xf32>
    %263 = tpu.matmul %220, %13, %cst_48 {dimension_numbers = #tpu.dot_dimension_numbers<[1], [0], [0], [1], [0, 0, 1, 1], [], []>} : vector<8x32xbf16>, vector<32x128xbf16>, vector<8x128xf32> -> vector<8x128xf32>
    %264 = vector.broadcast %17 : vector<1x128xf32> to vector<8x128xf32>
    %265 = arith.addf %263, %264 : vector<8x128xf32>
    %cst_49 = arith.constant dense<0.000000e+00> : vector<8x128xf32>
    %266 = tpu.matmul %242, %11, %cst_49 {dimension_numbers = #tpu.dot_dimension_numbers<[1], [0], [0], [1], [0, 0, 1, 1], [], []>} : vector<8x32xbf16>, vector<32x128xbf16>, vector<8x128xf32> -> vector<8x128xf32>
    %267 = arith.addf %265, %266 : vector<8x128xf32>
    %268 = arith.negf %267 : vector<8x128xf32>
    %269 = math.exp %268 : vector<8x128xf32>
    %cst_50 = arith.constant 1.000000e+00 : f32
    %270 = vector.broadcast %cst_50 : f32 to vector<8x128xf32>
    %271 = arith.addf %270, %269 : vector<8x128xf32>
    %272 = arith.divf %270, %271 : vector<8x128xf32>
    %273 = arith.mulf %272, %3 : vector<8x128xf32>
    %274 = arith.addf %273, %7 : vector<8x128xf32>
    %275 = vector.extract_strided_slice %274 {offsets = [0, 0], sizes = [8, 32], strides = [1, 1]} : vector<8x128xf32> to vector<8x32xf32>
    %276 = vector.extract_strided_slice %274 {offsets = [0, 32], sizes = [8, 32], strides = [1, 1]} : vector<8x128xf32> to vector<8x32xf32>
    %277 = vector.extract_strided_slice %274 {offsets = [0, 64], sizes = [8, 32], strides = [1, 1]} : vector<8x128xf32> to vector<8x32xf32>
    %278 = vector.extract_strided_slice %274 {offsets = [0, 96], sizes = [8, 32], strides = [1, 1]} : vector<8x128xf32> to vector<8x32xf32>
    %279 = arith.mulf %276, %239 : vector<8x32xf32>
    %280 = arith.mulf %275, %277 : vector<8x32xf32>
    %281 = arith.addf %279, %280 : vector<8x32xf32>
    %282 = math.tanh %281 : vector<8x32xf32>
    %283 = arith.mulf %278, %282 : vector<8x32xf32>
    %284 = arith.truncf %283 : vector<8x32xf32> to vector<8x32xbf16>
    %285 = vector.extract_strided_slice %22 {offsets = [56, 0], sizes = [8, 128], strides = [1, 1]} : vector<64x128xf32> to vector<8x128xf32>
    %cst_51 = arith.constant dense<0.000000e+00> : vector<8x128xf32>
    %286 = tpu.matmul %262, %9, %cst_51 {dimension_numbers = #tpu.dot_dimension_numbers<[1], [0], [0], [1], [0, 0, 1, 1], [], []>} : vector<8x32xbf16>, vector<32x128xbf16>, vector<8x128xf32> -> vector<8x128xf32>
    %287 = arith.addf %285, %286 : vector<8x128xf32>
    %288 = arith.negf %287 : vector<8x128xf32>
    %289 = math.exp %288 : vector<8x128xf32>
    %cst_52 = arith.constant 1.000000e+00 : f32
    %290 = vector.broadcast %cst_52 : f32 to vector<8x128xf32>
    %291 = arith.addf %290, %289 : vector<8x128xf32>
    %292 = arith.divf %290, %291 : vector<8x128xf32>
    %293 = arith.mulf %292, %3 : vector<8x128xf32>
    %294 = arith.addf %293, %7 : vector<8x128xf32>
    %295 = vector.extract_strided_slice %294 {offsets = [0, 0], sizes = [8, 32], strides = [1, 1]} : vector<8x128xf32> to vector<8x32xf32>
    %296 = vector.extract_strided_slice %294 {offsets = [0, 32], sizes = [8, 32], strides = [1, 1]} : vector<8x128xf32> to vector<8x32xf32>
    %297 = vector.extract_strided_slice %294 {offsets = [0, 64], sizes = [8, 32], strides = [1, 1]} : vector<8x128xf32> to vector<8x32xf32>
    %298 = vector.extract_strided_slice %294 {offsets = [0, 96], sizes = [8, 32], strides = [1, 1]} : vector<8x128xf32> to vector<8x32xf32>
    %299 = arith.mulf %296, %259 : vector<8x32xf32>
    %300 = arith.mulf %295, %297 : vector<8x32xf32>
    %301 = arith.addf %299, %300 : vector<8x32xf32>
    %302 = math.tanh %301 : vector<8x32xf32>
    %303 = arith.mulf %298, %302 : vector<8x32xf32>
    %304 = arith.truncf %303 : vector<8x32xf32> to vector<8x32xbf16>
    %cst_53 = arith.constant dense<0.000000e+00> : vector<8x128xf32>
    %305 = tpu.matmul %262, %13, %cst_53 {dimension_numbers = #tpu.dot_dimension_numbers<[1], [0], [0], [1], [0, 0, 1, 1], [], []>} : vector<8x32xbf16>, vector<32x128xbf16>, vector<8x128xf32> -> vector<8x128xf32>
    %306 = vector.broadcast %17 : vector<1x128xf32> to vector<8x128xf32>
    %307 = arith.addf %305, %306 : vector<8x128xf32>
    %cst_54 = arith.constant dense<0.000000e+00> : vector<8x128xf32>
    %308 = tpu.matmul %284, %11, %cst_54 {dimension_numbers = #tpu.dot_dimension_numbers<[1], [0], [0], [1], [0, 0, 1, 1], [], []>} : vector<8x32xbf16>, vector<32x128xbf16>, vector<8x128xf32> -> vector<8x128xf32>
    %309 = arith.addf %307, %308 : vector<8x128xf32>
    %310 = arith.negf %309 : vector<8x128xf32>
    %311 = math.exp %310 : vector<8x128xf32>
    %cst_55 = arith.constant 1.000000e+00 : f32
    %312 = vector.broadcast %cst_55 : f32 to vector<8x128xf32>
    %313 = arith.addf %312, %311 : vector<8x128xf32>
    %314 = arith.divf %312, %313 : vector<8x128xf32>
    %315 = arith.mulf %314, %3 : vector<8x128xf32>
    %316 = arith.addf %315, %7 : vector<8x128xf32>
    %317 = vector.extract_strided_slice %316 {offsets = [0, 0], sizes = [8, 32], strides = [1, 1]} : vector<8x128xf32> to vector<8x32xf32>
    %318 = vector.extract_strided_slice %316 {offsets = [0, 32], sizes = [8, 32], strides = [1, 1]} : vector<8x128xf32> to vector<8x32xf32>
    %319 = vector.extract_strided_slice %316 {offsets = [0, 64], sizes = [8, 32], strides = [1, 1]} : vector<8x128xf32> to vector<8x32xf32>
    %320 = vector.extract_strided_slice %316 {offsets = [0, 96], sizes = [8, 32], strides = [1, 1]} : vector<8x128xf32> to vector<8x32xf32>
    %321 = arith.mulf %318, %281 : vector<8x32xf32>
    %322 = arith.mulf %317, %319 : vector<8x32xf32>
    %323 = arith.addf %321, %322 : vector<8x32xf32>
    %324 = math.tanh %323 : vector<8x32xf32>
    %325 = arith.mulf %320, %324 : vector<8x32xf32>
    %326 = arith.truncf %325 : vector<8x32xf32> to vector<8x32xbf16>
    %cst_56 = arith.constant dense<0.000000e+00> : vector<8x128xf32>
    %327 = tpu.matmul %304, %13, %cst_56 {dimension_numbers = #tpu.dot_dimension_numbers<[1], [0], [0], [1], [0, 0, 1, 1], [], []>} : vector<8x32xbf16>, vector<32x128xbf16>, vector<8x128xf32> -> vector<8x128xf32>
    %328 = vector.broadcast %17 : vector<1x128xf32> to vector<8x128xf32>
    %329 = arith.addf %327, %328 : vector<8x128xf32>
    %cst_57 = arith.constant dense<0.000000e+00> : vector<8x128xf32>
    %330 = tpu.matmul %326, %11, %cst_57 {dimension_numbers = #tpu.dot_dimension_numbers<[1], [0], [0], [1], [0, 0, 1, 1], [], []>} : vector<8x32xbf16>, vector<32x128xbf16>, vector<8x128xf32> -> vector<8x128xf32>
    %331 = arith.addf %329, %330 : vector<8x128xf32>
    %332 = arith.negf %331 : vector<8x128xf32>
    %333 = math.exp %332 : vector<8x128xf32>
    %cst_58 = arith.constant 1.000000e+00 : f32
    %334 = vector.broadcast %cst_58 : f32 to vector<8x128xf32>
    %335 = arith.addf %334, %333 : vector<8x128xf32>
    %336 = arith.divf %334, %335 : vector<8x128xf32>
    %337 = arith.mulf %336, %3 : vector<8x128xf32>
    %338 = arith.addf %337, %7 : vector<8x128xf32>
    %339 = vector.extract_strided_slice %338 {offsets = [0, 0], sizes = [8, 32], strides = [1, 1]} : vector<8x128xf32> to vector<8x32xf32>
    %340 = vector.extract_strided_slice %338 {offsets = [0, 32], sizes = [8, 32], strides = [1, 1]} : vector<8x128xf32> to vector<8x32xf32>
    %341 = vector.extract_strided_slice %338 {offsets = [0, 64], sizes = [8, 32], strides = [1, 1]} : vector<8x128xf32> to vector<8x32xf32>
    %342 = vector.extract_strided_slice %338 {offsets = [0, 96], sizes = [8, 32], strides = [1, 1]} : vector<8x128xf32> to vector<8x32xf32>
    %343 = arith.mulf %340, %323 : vector<8x32xf32>
    %344 = arith.mulf %339, %341 : vector<8x32xf32>
    %345 = arith.addf %343, %344 : vector<8x32xf32>
    %346 = math.tanh %345 : vector<8x32xf32>
    %347 = arith.mulf %342, %346 : vector<8x32xf32>
    %348 = arith.truncf %347 : vector<8x32xf32> to vector<8x32xbf16>
    %c0_59 = arith.constant 0 : index
    %c0_60 = arith.constant 0 : index
    %349 = vector.load %arg5[%c0_59, %c0_60] : memref<32x128xbf16, #tpu.memory_space<vmem>>, vector<32x128xbf16>
    %cst_61 = arith.constant dense<0.000000e+00> : vector<8x128xf32>
    %350 = tpu.matmul %348, %349, %cst_61 {dimension_numbers = #tpu.dot_dimension_numbers<[1], [0], [0], [1], [0, 0, 1, 1], [], []>} : vector<8x32xbf16>, vector<32x128xbf16>, vector<8x128xf32> -> vector<8x128xf32>
    %c0_62 = arith.constant 0 : index
    %c0_63 = arith.constant 0 : index
    %351 = vector.load %arg6[%c0_62, %c0_63] : memref<1x128xf32, #tpu.memory_space<vmem>>, vector<1x128xf32>
    %352 = vector.broadcast %351 : vector<1x128xf32> to vector<8x128xf32>
    %353 = arith.addf %350, %352 : vector<8x128xf32>
    %c0_64 = arith.constant 0 : index
    %c0_65 = arith.constant 0 : index
    %354 = vector.load %arg7[%c0_64, %c0_65] : memref<8x128xf32, #tpu.memory_space<vmem>>, vector<8x128xf32>
    tpu.vector_store %arg7[%c0_64, %c0_65], %353 {strides = array<i32>} : memref<8x128xf32, #tpu.memory_space<vmem>>, vector<8x128xf32>,
    return
  }
}

</mosaic_0001>

<bundles_post_ra>
// kernel: tpu_custom_call.1
= control target key start
LH: loop header
LB: loop body
LE: loop exit
PB: predicated region body
PF: predicated region fallthrough
CT: control target
= control target key end

     0   :  { %12 = vsyncpa [#allocation3], 0  ;;  %s1968_s0 = inlined_call_operand.vmem [shape: bf16[64,8], index: 0, kind: input, shape index: {}]   ;;  %s1969_s1 = inlined_call_operand.vmem [shape: bf16[8,128], index: 1, kind: input, shape index: {}]   ;;  %s1970_s2 = inlined_call_operand.vmem [shape: bf16[2,32,128], index: 2, kind: input, shape index: {}]   ;;  %s1971_s3 = inlined_call_operand.hbm [shape: bf16[1,32,128], index: 3, kind: input, shape index: {}]   ;;  %s1972_s4 = inlined_call_operand.hbm [shape: f32[4,1,128], index: 4, kind: input, shape index: {}]   ;;  %s1973_s5 = inlined_call_operand.hbm [shape: bf16[32,128], index: 5, kind: input, shape index: {}]   ;;  %s1974_s6 = inlined_call_operand.vmem [shape: f32[1,128], index: 6, kind: input, shape index: {}]   ;;  %s1975_s7 = inlined_call_operand.hbm [shape: f32[8,128], index: 7, kind: output, shape index: {}]  }
   0x1   :  { %13 = vsyncpa [#allocation6], 0  ;;  %s38_s26 = sshll.u32 %s1972_s4, 4  ;;  %s39_s26 = int_to_ptr.hbm [resolvable:$true] %s38_s26 }
   0x2   :  { %14 = vsyncpa [#allocation4], 0  ;;  %s1611_s27 = smov [#allocation5]   ;;  %s25_s8 = sshll.u32 %s1971_s3, 4  ;;  %s26_s8 = int_to_ptr.hbm [resolvable:$true] %s25_s8 }
   0x3   :  { %s40_s28 = sshll.u32 %s1611_s27, 4  ;;  %s1612_s9 = smov 16   ;;  %s41_s28 = int_to_ptr.vmem [resolvable:$true] %s40_s28 }
   0x4   :  { %s1613_s10 = smov 1   ;;  %s1614_s11 = smov [#allocation2]  }
   0x5   :  { %46 = dma.hbm_to_vmem [thread:$0]  %s39_s26, 64, %s41_s28, [#allocation6], %s1612_s9, %s1612_s9, %s1613_s10  }
   0x6   :  { %s27_s12 = sshll.u32 %s1614_s11, 4  ;;  %s1615_s13 = smov 64   ;;  %s28_s12 = int_to_ptr.vmem [resolvable:$true] %s27_s12 }
   0x7   :  { %s1616_s14 = smov 4   ;;  %s51_s16 = sshll.u32 %s1973_s5, 4  ;;  %s52_s16 = int_to_ptr.hbm [resolvable:$true] %s51_s16 }
   0x8   :  { %33 = dma.hbm_to_vmem [thread:$0]  %s26_s8, 256, %s28_s12, [#allocation3], %s1615_s13, %s1615_s13, %s1616_s14  }
   0x9   :  { %s1617_s17 = smov [#allocation7]  }
   0xa   :  { %s53_s18 = sshll.u32 %s1617_s17, 4  ;;  %s54_s18 = int_to_ptr.vmem [resolvable:$true] %s53_s18 }
   0xb   :  { %59 = dma.hbm_to_vmem [thread:$0]  %s52_s16, 256, %s54_s18, [#allocation6], %s1615_s13, %s1615_s13, %s1616_s14  }
   0xc   :  { %1605 = dma.done.wait [#allocation3], 256  }
   0xd   :  { %1606 = vsyncadd [#allocation3], 4294967040 }
   0xe   :  { %1607 = dma.done.wait [#allocation6], 320  }
   0xf   :  { %1608 = vsyncadd [#allocation6], 4294966976  ;;  %vm146_vm0 = vcmask 1043456   ;;  %v109_v0 = vld [vmem:[%s1969_s1] sm:$0xf]  ;;  %vm133_vm1 = vcmask 64512  }
  0x10   :  { %v148_v1 = vsel %vm146_vm0, %v109_v0, 0  ;;  %v1388_v2 = vld [vmem:[%s1968_s0] sm:$0xff]  ;;  %v1681_v3 = vld [vmem:[#allocation5] ss:$0 sm:$0xff]  ;;  %v1684_v15 = vld [vmem:[#allocation5 + $0x2] ss:$0 sm:$0xff] }
  0x11   :  { %157 = vmatpush.bf16.msra.mxu0 %v148_v1  ;;  %v1686_v18 = vld [vmem:[#allocation5 + $0x3] ss:$0 sm:$0xff]  ;;  %s1618_s1 = smov 32   ;;  %s1619_s5 = smov 96   ;;  %v1696_v26 = vld [vmem:[%s1970_s2 + $0x8] sm:$0xff]  ;;  %v1705_v28 = vld [vmem:[%s1970_s2] sm:$0xff] }
  0x12   :  { %v1698_v27 = vld [vmem:[#allocation2 + $0x8] sm:$0xff]  ;;  %237 = vmatpush.bf16.msra.mxu1 %v1696_v26  ;;  %v1707_v29 = vld [vmem:[#allocation2] sm:$0xff]  ;;  %361 = vmatpush.bf16.msra.mxu3 %v1696_v26  ;;  %vm227_vm6 = vcmask 261120   ;;  %v1725_v39 = vld [vmem:[#allocation5 + $0x1] ss:$0 sm:$0xff]  ;;  %s1620_s14 = smov [#allocation8]  }
  0x13   :  { %309 = vmatpush.bf16.msra.mxu2 %v1698_v27  ;;  %s1274_s4 = sshll.u32 %s1620_s14, 4  ;;  %s1276_s16 = sshll.u32 %s1975_s7, 4  ;;  %s1275_s4 = int_to_ptr.vmem [resolvable:$true] %s1274_s4  ;;  %s1277_s16 = int_to_ptr.hbm [resolvable:$true] %s1276_s16 }
  0x14   :  { %1307 = vmatmul.msk.bf16.vlgmr.msra.gmra.mxu0 %vm133_vm1, %v1388_v2 }
  0x15   :  { %823 = vmatpush.bf16.msrb.mxu0 %v1698_v27 }
  0x16   :  { %238 = vmatpush.bf16.msra.mxu1 %v1705_v28  ;;  %362 = vmatpush.bf16.msra.mxu3 %v1705_v28 }
  0x17   :  { %310 = vmatpush.bf16.msra.mxu2 %v1707_v29 }
  0x19   :  { %824 = vmatpush.bf16.msrb.mxu0 %v1707_v29 }
  0x1a   :  { %414 = vmatpush.bf16.msrb.mxu1 %v1698_v27  ;;  %508 = vmatpush.bf16.msrb.mxu3 %v1696_v26 }
  0x1e   :  { %415 = vmatpush.bf16.msrb.mxu1 %v1707_v29  ;;  %509 = vmatpush.bf16.msrb.mxu3 %v1705_v28 }
  0x91   :  { %v159_v4 = vpop.f32.mrf.mxu0 }
  0x92   :  { %v160_v5 = vadd.f32 %v1681_v3, %v159_v4 }
  0x94   :  { %v1311_v6 = vmul.f32 -1.442695, %v160_v5 }
  0x96   :  { %1409 = vpow2.f32 %v1311_v6 }
  0x99   :  { %v161_v34 = vpop.f32.mrf.mxu0 }
  0x9a   :  { %v162_v35 = vadd.f32 %v1681_v3, %v161_v34 }
  0x9c   :  { %v1410_v7 = vpop.eup %1409 }
  0x9d   :  { %v182_v8 = vadd.f32 1.0, %v1410_v7 }
  0x9f   :  { %1411 = vrcp.f32 %v182_v8  ;;  %v194_v12 = vand.u32 2147483648, %v182_v8  ;;  %v192_v14 = vand.u32 2147483647, %v182_v8  ;;  %vm188_vm3 = vweird.f32 %v182_v8 }
  0xa1   :  { %v195_v17 = vor.u32 1.1754944e-38, %v194_v12  ;;  %vm193_vm5 = vcmp.eq.f32.partialorder %v192_v14, 8.507059e+37 }
  0xa5   :  { %v1412_v9 = vpop.eup %1411 }
  0xa6   :  { %v184_v10 = vmul.f32 %v1412_v9, %v182_v8  ;;  %vm189_vm2 = vweird.f32 %v1412_v9 }
  0xa7   :  { %vm190_vm4 = vmor %vm188_vm3, %vm189_vm2 }
  0xa8   :  { %v185_v11 = vsub.f32 1.0, %v184_v10 }
  0xaa   :  { %v186_v13 = vmul.f32 %v1412_v9, %v185_v11 }
  0xac   :  { %v187_v16 = vadd.f32 %v1412_v9, %v186_v13 }
  0xae   :  { %v191_v19 = vsel %vm190_vm4, %v1412_v9, %v187_v16 }
  0xaf   :  { %v196_v20 = vsel %vm193_vm5, %v195_v17, %v191_v19 }
  0xb0   :  { %v198_v21 = vmul.f32 %v1684_v15, %v196_v20 }
  0xb2   :  { %v199_v22 = vadd.f32 %v1686_v18, %v198_v21 }
  0xb4   :  { %201 = vrot.lane.b32.xlu0 %v199_v22, %s1615_s13 }
 0x126   :  { %v202_v23 = vpop.permute.xlu0 %201 }
 0x127   :  { %v204_v24 = vmul.f32 %v202_v23, %v199_v22 }
 0x129   :  { %1413 = vtanh.f32 %v204_v24  ;;  %267 = vrot.lane.b32.xlu2 %v204_v24, %s1618_s1 }
 0x12f   :  { %v1414_v25 = vpop.eup %1413 }
 0x130   :  { %207 = vrot.lane.b32.xlu0 %v1414_v25, %s1619_s5  ;;  %v1747_v25 = vld [vmem:[%s1970_s2 + $0x18] sm:$0xff] }
 0x131   :  { %445 = vmatpush.bf16.msrb.mxu2 %v1747_v25  ;;  %973 = vmatpush.bf16.msra.mxu0 %v1747_v25 }
 0x183   :  { %v268_v16 = vpop.permute.xlu2 %267 }
 0x1a2   :  { %v208_v30 = vpop.permute.xlu0 %207 }
 0x1a3   :  { %v210_v31 = vmul.f32 %v208_v30, %v199_v22  ;;  %v1754_v30 = vld [vmem:[%s1970_s2 + $0x10] sm:$0xff] }
 0x1a4   :  { %446 = vmatpush.bf16.msrb.mxu2 %v1754_v30  ;;  %974 = vmatpush.bf16.msra.mxu0 %v1754_v30 }
 0x1a5   :  { %v211_v32 = vpack.c.bf16 %v210_v31, %v210_v31  ;;  %v1389_v31 = vld [vmem:[%s1968_s0 + $0x8] sm:$0xff] }
 0x1a6   :  { %1308 = vmatmul.msk.bf16.gmra.mxu0 %vm133_vm1, %v1389_v31 }
 0x1a7   :  { %213 = vrot.lane.b32.xlu1 %v211_v32, %s1618_s1 }
 0x219   :  { %v214_v33 = vpop.permute.xlu1 %213 }
 0x21a   :  { %1320 = vmatmul.msk.bf16.vlgmr.msra.gmra.mxu1 %vm227_vm6, %v214_v33  ;;  %1330 = vmatmul.msk.bf16.vlgmr.msra.gmra.mxu2 %vm227_vm6, %v214_v33 }
 0x21b   :  { %561 = vmatpush.bf16.msra.mxu1 %v1698_v27  ;;  %580 = vmatpush.bf16.msra.mxu2 %v1747_v25 }
 0x21f   :  { %562 = vmatpush.bf16.msra.mxu1 %v1707_v29  ;;  %581 = vmatpush.bf16.msra.mxu2 %v1754_v30 }
 0x297   :  { %v240_v36 = vpop.f32.mrf.mxu1 }
 0x298   :  { %v244_v37 = vadd.f32 %v240_v36, %v162_v35 }
 0x29a   :  { %v1321_v38 = vmul.f32 -1.442695, %v244_v37 }
 0x29c   :  { %1415 = vpow2.f32 %v1321_v38 }
 0x29d   :  { %v312_v40 = vpop.f32.mrf.mxu2 }
 0x29e   :  { %v313_v41 = vadd.f32 %v1725_v39, %v312_v40 }
 0x29f   :  { %v242_v42 = vpop.f32.mrf.mxu1 }
 0x2a0   :  { %v1331_v43 = vmul.f32 -1.442695, %v313_v41  ;;  %v164_v42 = vpop.f32.mrf.mxu0 }
 0x2a2   :  { %v1416_v44 = vpop.eup %1415  ;;  %1417 = vpow2.f32 %v1331_v43  ;;  %v165_v43 = vadd.f32 %v1681_v3, %v164_v42 }
 0x2a3   :  { %v248_v45 = vadd.f32 1.0, %v1416_v44 }
 0x2a5   :  { %1419 = vrcp.f32 %v248_v45  ;;  %v314_v46 = vpop.f32.mrf.mxu2  ;;  %v260_v52 = vand.u32 2147483648, %v248_v45  ;;  %v258_v54 = vand.u32 2147483647, %v248_v45  ;;  %vm254_vm8 = vweird.f32 %v248_v45 }
 0x2a7   :  { %v261_v58 = vor.u32 1.1754944e-38, %v260_v52  ;;  %vm259_vm10 = vcmp.eq.f32.partialorder %v258_v54, 8.507059e+37 }
 0x2a8   :  { %v1418_v47 = vpop.eup %1417 }
 0x2a9   :  { %v319_v48 = vadd.f32 1.0, %v1418_v47 }
 0x2ab   :  { %v1420_v49 = vpop.eup %1419  ;;  %1421 = vrcp.f32 %v319_v48  ;;  %v331_v62 = vand.u32 2147483648, %v319_v48  ;;  %v329_v1 = vand.u32 2147483647, %v319_v48  ;;  %vm325_vm12 = vweird.f32 %v319_v48 }
 0x2ac   :  { %v250_v50 = vmul.f32 %v1420_v49, %v248_v45  ;;  %vm255_vm7 = vweird.f32 %v1420_v49 }
 0x2ad   :  { %vm256_vm9 = vmor %vm254_vm8, %vm255_vm7  ;;  %v332_v5 = vor.u32 1.1754944e-38, %v331_v62  ;;  %vm330_vm14 = vcmp.eq.f32.partialorder %v329_v1, 8.507059e+37 }
 0x2ae   :  { %v251_v51 = vsub.f32 1.0, %v250_v50 }
 0x2b0   :  { %v252_v53 = vmul.f32 %v1420_v49, %v251_v51 }
 0x2b1   :  { %v1422_v55 = vpop.eup %1421 }
 0x2b2   :  { %v321_v56 = vmul.f32 %v1422_v55, %v319_v48  ;;  %v253_v57 = vadd.f32 %v1420_v49, %v252_v53  ;;  %vm326_vm11 = vweird.f32 %v1422_v55 }
 0x2b3   :  { %vm327_vm13 = vmor %vm325_vm12, %vm326_vm11 }
 0x2b4   :  { %v322_v59 = vsub.f32 1.0, %v321_v56  ;;  %v257_v60 = vsel %vm256_vm9, %v1420_v49, %v253_v57 }
 0x2b5   :  { %v262_v61 = vsel %vm259_vm10, %v261_v58, %v257_v60 }
 0x2b6   :  { %v264_v63 = vmul.f32 %v1684_v15, %v262_v61  ;;  %v323_v0 = vmul.f32 %v1422_v55, %v322_v59 }
 0x2b8   :  { %v265_v2 = vadd.f32 %v1686_v18, %v264_v63  ;;  %v324_v4 = vadd.f32 %v1422_v55, %v323_v0 }
 0x2ba   :  { %272 = vrot.lane.b32.xlu1 %v265_v2, %s1615_s13  ;;  %v328_v6 = vsel %vm327_vm13, %v1422_v55, %v324_v4  ;;  %v270_v17 = vmul.f32 %v268_v16, %v265_v2 }
 0x2bb   :  { %v333_v7 = vsel %vm330_vm14, %v332_v5, %v328_v6 }
 0x2bc   :  { %v335_v8 = vmul.f32 %v1684_v15, %v333_v7 }
 0x2be   :  { %v336_v9 = vadd.f32 %v1686_v18, %v335_v8 }
 0x2c0   :  { %338 = vrot.lane.b32.xlu0 %v336_v9, %s1615_s13 }
 0x32c   :  { %v273_v10 = vpop.permute.xlu1 %272 }
 0x32d   :  { %v275_v11 = vmul.f32 %v273_v10, %v265_v2 }
 0x32f   :  { %277 = vrot.lane.b32.xlu2 %v275_v11, %s1618_s1 }
 0x332   :  { %v339_v12 = vpop.permute.xlu0 %338 }
 0x333   :  { %v1735_v13 = vmul.f32 %v339_v12, %v336_v9 }
 0x335   :  { %1423 = vtanh.f32 %v1735_v13 }
 0x33b   :  { %v1424_v14 = vpop.eup %1423 }
 0x33c   :  { %344 = vrot.lane.b32.xlu2 %v1424_v14, %s1619_s5 }
 0x389   :  { %v278_v19 = vpop.permute.xlu2 %277 }
 0x38a   :  { %v1739_v20 = vadd.f32 %v278_v19, %v270_v17 }
 0x38c   :  { %1425 = vtanh.f32 %v1739_v20 }
 0x392   :  { %v1426_v21 = vpop.eup %1425 }
 0x393   :  { %283 = vrot.lane.b32.xlu1 %v1426_v21, %s1615_s13 }
 0x396   :  { %v345_v22 = vpop.permute.xlu2 %344 }
 0x397   :  { %v347_v23 = vmul.f32 %v345_v22, %v336_v9 }
 0x399   :  { %v348_v24 = vpack.c.bf16 %v347_v23, %v347_v23 }
 0x39b   :  { %422 = vrot.lane.b32.xlu1 %v348_v24, %s1618_s1 }
 0x405   :  { %v284_v32 = vpop.permute.xlu1 %283 }
 0x406   :  { %v286_v33 = vmul.f32 %v284_v32, %v265_v2 }
 0x408   :  { %v287_v34 = vpack.c.bf16 %v286_v33, %v286_v33 }
 0x40a   :  { %350 = vrot.lane.b32.xlu0 %v287_v34, %s1618_s1 }
 0x40d   :  { %v423_v35 = vpop.permute.xlu1 %422 }
 0x40e   :  { %1343 = vmatmul.msk.bf16.vlgmr.msrb.gmra.mxu2 %vm227_vm6, %v423_v35 }
 0x40f   :  { %711 = vmatpush.bf16.msrb.mxu2 %v1747_v25 }
 0x413   :  { %712 = vmatpush.bf16.msrb.mxu2 %v1754_v30 }
 0x47c   :  { %v351_v36 = vpop.permute.xlu0 %350 }
 0x47d   :  { %1332 = vmatmul.msk.bf16.vlgmr.msra.gmra.mxu3 %vm227_vm6, %v351_v36  ;;  %1334 = vmatmul.msk.bf16.vlgmr.msrb.gmra.mxu1 %vm227_vm6, %v351_v36 }
 0x47e   :  { %639 = vmatpush.bf16.msra.mxu3 %v1696_v26  ;;  %692 = vmatpush.bf16.msrb.mxu1 %v1698_v27 }
 0x482   :  { %640 = vmatpush.bf16.msra.mxu3 %v1705_v28  ;;  %693 = vmatpush.bf16.msrb.mxu1 %v1707_v29 }
 0x491   :  { %v448_v37 = vpop.f32.mrf.mxu2 }
 0x499   :  { %v450_v38 = vpop.f32.mrf.mxu2 }
 0x4fa   :  { %v417_v40 = vpop.f32.mrf.mxu1 }
 0x4fb   :  { %v418_v41 = vadd.f32 %v1725_v39, %v417_v40 }
 0x4fd   :  { %v452_v44 = vadd.f32 %v448_v37, %v418_v41 }
 0x4ff   :  { %v1344_v45 = vmul.f32 -1.442695, %v452_v44 }
 0x500   :  { %v364_v46 = vpop.f32.mrf.mxu3 }
 0x501   :  { %1427 = vpow2.f32 %v1344_v45  ;;  %v368_v47 = vadd.f32 %v364_v46, %v165_v43 }
 0x502   :  { %v419_v48 = vpop.f32.mrf.mxu1 }
 0x503   :  { %v1333_v49 = vmul.f32 -1.442695, %v368_v47  ;;  %v166_v48 = vpop.f32.mrf.mxu0 }
 0x505   :  { %1429 = vpow2.f32 %v1333_v49 }
 0x507   :  { %v1428_v50 = vpop.eup %1427 }
 0x508   :  { %v456_v51 = vadd.f32 1.0, %v1428_v50  ;;  %v366_v52 = vpop.f32.mrf.mxu3 }
 0x50a   :  { %1431 = vrcp.f32 %v456_v51  ;;  %v466_v59 = vand.u32 2147483647, %v456_v51  ;;  %v468_v60 = vand.u32 2147483648, %v456_v51  ;;  %vm462_vm0 = vweird.f32 %v456_v51 }
 0x50b   :  { %v1430_v53 = vpop.eup %1429 }
 0x50c   :  { %v372_v54 = vadd.f32 1.0, %v1430_v53  ;;  %vm467_vm3 = vcmp.eq.f32.partialorder %v466_v59, 8.507059e+37  ;;  %v469_v1 = vor.u32 1.1754944e-38, %v468_v60 }
 0x50e   :  { %1433 = vrcp.f32 %v372_v54  ;;  %v384_v2 = vand.u32 2147483648, %v372_v54  ;;  %v382_v6 = vand.u32 2147483647, %v372_v54  ;;  %vm378_vm5 = vweird.f32 %v372_v54 }
 0x510   :  { %v1432_v55 = vpop.eup %1431  ;;  %v385_v10 = vor.u32 1.1754944e-38, %v384_v2  ;;  %vm383_vm8 = vcmp.eq.f32.partialorder %v382_v6, 8.507059e+37 }
 0x511   :  { %v458_v56 = vmul.f32 %v1432_v55, %v456_v51  ;;  %vm463_vm15 = vweird.f32 %v1432_v55  ;;  %v167_v51 = vadd.f32 %v1681_v3, %v166_v48 }
 0x512   :  { %vm464_vm2 = vmor %vm462_vm0, %vm463_vm15 }
 0x513   :  { %v459_v57 = vsub.f32 1.0, %v458_v56 }
 0x514   :  { %v1434_v58 = vpop.eup %1433 }
 0x515   :  { %v374_v61 = vmul.f32 %v1434_v58, %v372_v54  ;;  %v460_v62 = vmul.f32 %v1432_v55, %v459_v57  ;;  %vm379_vm4 = vweird.f32 %v1434_v58 }
 0x516   :  { %vm380_vm7 = vmor %vm378_vm5, %vm379_vm4 }
 0x517   :  { %v375_v63 = vsub.f32 1.0, %v374_v61  ;;  %v461_v0 = vadd.f32 %v1432_v55, %v460_v62 }
 0x519   :  { %v376_v4 = vmul.f32 %v1434_v58, %v375_v63  ;;  %v465_v5 = vsel %vm464_vm2, %v1432_v55, %v461_v0 }
 0x51a   :  { %v470_v7 = vsel %vm467_vm3, %v469_v1, %v465_v5 }
 0x51b   :  { %v472_v8 = vmul.f32 %v1684_v15, %v470_v7  ;;  %v377_v9 = vadd.f32 %v1434_v58, %v376_v4 }
 0x51d   :  { %v473_v11 = vadd.f32 %v1686_v18, %v472_v8  ;;  %v381_v12 = vsel %vm380_vm7, %v1434_v58, %v377_v9 }
 0x51e   :  { %v386_v14 = vsel %vm383_vm8, %v385_v10, %v381_v12 }
 0x51f   :  { %480 = vrot.lane.b32.xlu0 %v473_v11, %s1615_s13  ;;  %v388_v16 = vmul.f32 %v1684_v15, %v386_v14 }
 0x521   :  { %v389_v17 = vadd.f32 %v1686_v18, %v388_v16 }
 0x523   :  { %392 = vrot.lane.b32.xlu2 %v389_v17, %s1615_s13  ;;  %v390_v24 = vmul.f32 %v389_v17, %v1739_v20 }
 0x52b   :  { %475 = vrot.lane.b32.xlu2 %v1735_v13, %s1618_s1 }
 0x57d   :  { %v393_v19 = vpop.permute.xlu2 %392 }
 0x57e   :  { %v395_v21 = vmul.f32 %v393_v19, %v389_v17 }
 0x580   :  { %397 = vrot.lane.b32.xlu1 %v395_v21, %s1618_s1 }
 0x585   :  { %v476_v34 = vpop.permute.xlu2 %475 }
 0x586   :  { %v478_v13 = vmul.f32 %v476_v34, %v473_v11 }
 0x591   :  { %v481_v22 = vpop.permute.xlu0 %480 }
 0x592   :  { %v483_v23 = vmul.f32 %v481_v22, %v473_v11 }
 0x594   :  { %485 = vrot.lane.b32.xlu0 %v483_v23, %s1618_s1 }
 0x5f2   :  { %v398_v31 = vpop.permute.xlu1 %397 }
 0x5f3   :  { %v1787_v32 = vadd.f32 %v398_v31, %v390_v24 }
 0x5f5   :  { %1435 = vtanh.f32 %v1787_v32 }
 0x5fb   :  { %v1436_v33 = vpop.eup %1435 }
 0x5fc   :  { %403 = vrot.lane.b32.xlu1 %v1436_v33, %s1615_s13 }
 0x606   :  { %v486_v35 = vpop.permute.xlu0 %485 }
 0x607   :  { %v1791_v36 = vadd.f32 %v486_v35, %v478_v13 }
 0x609   :  { %1437 = vtanh.f32 %v1791_v36 }
 0x60f   :  { %v1438_v37 = vpop.eup %1437 }
 0x610   :  { %491 = vrot.lane.b32.xlu2 %v1438_v37, %s1615_s13 }
 0x66a   :  { %v492_v38 = vpop.permute.xlu2 %491 }
 0x66b   :  { %v494_v20 = vmul.f32 %v492_v38, %v473_v11 }
 0x66d   :  { %v495_v40 = vpack.c.bf16 %v494_v20, %v494_v20 }
 0x66e   :  { %v404_v41 = vpop.permute.xlu1 %403 }
 0x66f   :  { %v406_v42 = vmul.f32 %v404_v41, %v389_v17  ;;  %569 = vrot.lane.b32.xlu1 %v495_v40, %s1618_s1 }
 0x671   :  { %v407_v43 = vpack.c.bf16 %v406_v42, %v406_v42 }
 0x673   :  { %497 = vrot.lane.b32.xlu0 %v407_v43, %s1618_s1 }
 0x6e1   :  { %v570_v44 = vpop.permute.xlu1 %569 }
 0x6e2   :  { %1348 = vmatmul.msk.bf16.vlgmr.msra.gmra.mxu2 %vm227_vm6, %v570_v44 }
 0x6e3   :  { %901 = vmatpush.bf16.msra.mxu2 %v1696_v26 }
 0x6e5   :  { %v498_v45 = vpop.permute.xlu0 %497 }
 0x6e6   :  { %1345 = vmatmul.msk.bf16.vlgmr.msrb.gmra.mxu3 %vm227_vm6, %v498_v45  ;;  %1347 = vmatmul.msk.bf16.vlgmr.msra.gmra.mxu1 %vm227_vm6, %v498_v45 }
 0x6e7   :  { %770 = vmatpush.bf16.msrb.mxu3 %v1696_v26  ;;  %842 = vmatpush.bf16.msra.mxu1 %v1747_v25 }
 0x6e8   :  { %902 = vmatpush.bf16.msra.mxu2 %v1705_v28 }
 0x6eb   :  { %771 = vmatpush.bf16.msrb.mxu3 %v1705_v28  ;;  %843 = vmatpush.bf16.msra.mxu1 %v1754_v30 }
 0x763   :  { %v564_v46 = vpop.f32.mrf.mxu1 }
 0x764   :  { %v565_v47 = vadd.f32 %v1725_v39, %v564_v46 }
 0x765   :  { %v583_v49 = vpop.f32.mrf.mxu2 }
 0x766   :  { %v587_v50 = vadd.f32 %v583_v49, %v565_v47 }
 0x768   :  { %v1349_v52 = vmul.f32 -1.442695, %v587_v50 }
 0x769   :  { %v511_v53 = vpop.f32.mrf.mxu3 }
 0x76a   :  { %1439 = vpow2.f32 %v1349_v52  ;;  %v515_v54 = vadd.f32 %v511_v53, %v167_v51 }
 0x76b   :  { %v566_v55 = vpop.f32.mrf.mxu1 }
 0x76c   :  { %v1346_v56 = vmul.f32 -1.442695, %v515_v54 }
 0x76d   :  { %v585_v57 = vpop.f32.mrf.mxu2 }
 0x76e   :  { %1441 = vpow2.f32 %v1346_v56 }
 0x770   :  { %v1440_v58 = vpop.eup %1439 }
 0x771   :  { %v591_v59 = vadd.f32 1.0, %v1440_v58  ;;  %v513_v60 = vpop.f32.mrf.mxu3 }
 0x773   :  { %1443 = vrcp.f32 %v591_v59  ;;  %v601_v4 = vand.u32 2147483647, %v591_v59  ;;  %v603_v5 = vand.u32 2147483648, %v591_v59  ;;  %vm597_vm10 = vweird.f32 %v591_v59 }
 0x774   :  { %v1442_v61 = vpop.eup %1441 }
 0x775   :  { %v519_v62 = vadd.f32 1.0, %v1442_v61  ;;  %vm602_vm12 = vcmp.eq.f32.partialorder %v601_v4, 8.507059e+37  ;;  %v604_v10 = vor.u32 1.1754944e-38, %v603_v5 }
 0x777   :  { %1445 = vrcp.f32 %v519_v62  ;;  %v531_v11 = vand.u32 2147483648, %v519_v62  ;;  %v529_v16 = vand.u32 2147483647, %v519_v62  ;;  %vm525_vm14 = vweird.f32 %v519_v62 }
 0x779   :  { %v1444_v63 = vpop.eup %1443  ;;  %v532_v22 = vor.u32 1.1754944e-38, %v531_v11  ;;  %vm530_vm0 = vcmp.eq.f32.partialorder %v529_v16, 8.507059e+37 }
 0x77a   :  { %v593_v0 = vmul.f32 %v1444_v63, %v591_v59  ;;  %vm598_vm9 = vweird.f32 %v1444_v63 }
 0x77b   :  { %vm599_vm11 = vmor %vm597_vm10, %vm598_vm9 }
 0x77c   :  { %v594_v1 = vsub.f32 1.0, %v593_v0 }
 0x77d   :  { %v1446_v2 = vpop.eup %1445 }
 0x77e   :  { %v595_v6 = vmul.f32 %v1444_v63, %v594_v1  ;;  %v521_v7 = vmul.f32 %v1446_v2, %v519_v62  ;;  %vm526_vm13 = vweird.f32 %v1446_v2 }
 0x77f   :  { %vm527_vm15 = vmor %vm525_vm14, %vm526_vm13 }
 0x780   :  { %v522_v8 = vsub.f32 1.0, %v521_v7  ;;  %v596_v9 = vadd.f32 %v1444_v63, %v595_v6 }
 0x782   :  { %v523_v12 = vmul.f32 %v1446_v2, %v522_v8  ;;  %v600_v14 = vsel %vm599_vm11, %v1444_v63, %v596_v9 }
 0x783   :  { %v605_v17 = vsel %vm602_vm12, %v604_v10, %v600_v14 }
 0x784   :  { %v607_v19 = vmul.f32 %v1684_v15, %v605_v17  ;;  %v524_v21 = vadd.f32 %v1446_v2, %v523_v12 }
 0x786   :  { %v608_v23 = vadd.f32 %v1686_v18, %v607_v19  ;;  %v528_v24 = vsel %vm527_vm15, %v1446_v2, %v524_v21 }
 0x787   :  { %v533_v31 = vsel %vm530_vm0, %v532_v22, %v528_v24 }
 0x788   :  { %611 = vrot.lane.b32.xlu0 %v608_v23, %s1615_s13  ;;  %v535_v33 = vmul.f32 %v1684_v15, %v533_v31  ;;  %v609_v20 = vmul.f32 %v608_v23, %v1791_v36  ;;  %v1390_v36 = vld [vmem:[%s1968_s0 + $0x10] sm:$0xff] }
 0x789   :  { %1309 = vmatmul.msk.bf16.gmra.mxu0 %vm133_vm1, %v1390_v36 }
 0x78a   :  { %v536_v34 = vadd.f32 %v1686_v18, %v535_v33 }
 0x78c   :  { %539 = vrot.lane.b32.xlu2 %v536_v34, %s1615_s13  ;;  %v537_v42 = vmul.f32 %v536_v34, %v1787_v32 }
 0x7e6   :  { %v540_v13 = vpop.permute.xlu2 %539 }
 0x7e7   :  { %v542_v35 = vmul.f32 %v540_v13, %v536_v34 }
 0x7e9   :  { %544 = vrot.lane.b32.xlu1 %v542_v35, %s1618_s1 }
 0x7fa   :  { %v612_v37 = vpop.permute.xlu0 %611 }
 0x7fb   :  { %v614_v38 = vmul.f32 %v612_v37, %v608_v23 }
 0x7fd   :  { %616 = vrot.lane.b32.xlu2 %v614_v38, %s1618_s1 }
 0x806   :  { %v169_v55 = vpop.f32.mrf.mxu0 }
 0x807   :  { %v170_v56 = vadd.f32 %v1681_v3, %v169_v55 }
 0x857   :  { %v617_v40 = vpop.permute.xlu2 %616 }
 0x858   :  { %v1817_v41 = vadd.f32 %v617_v40, %v609_v20 }
 0x85a   :  { %1447 = vtanh.f32 %v1817_v41 }
 0x85b   :  { %v545_v43 = vpop.permute.xlu1 %544 }
 0x85c   :  { %v1821_v44 = vadd.f32 %v545_v43, %v537_v42 }
 0x85e   :  { %1449 = vtanh.f32 %v1821_v44 }
 0x860   :  { %v1448_v45 = vpop.eup %1447 }
 0x861   :  { %622 = vrot.lane.b32.xlu1 %v1448_v45, %s1615_s13 }
 0x864   :  { %v1450_v46 = vpop.eup %1449 }
 0x865   :  { %550 = vrot.lane.b32.xlu0 %v1450_v46, %s1615_s13 }
 0x8d3   :  { %v623_v47 = vpop.permute.xlu1 %622 }
 0x8d4   :  { %v625_v48 = vmul.f32 %v623_v47, %v608_v23 }
 0x8d6   :  { %v626_v32 = vpack.c.bf16 %v625_v48, %v625_v48 }
 0x8d7   :  { %v551_v49 = vpop.permute.xlu0 %550 }
 0x8d8   :  { %v553_v50 = vmul.f32 %v551_v49, %v536_v34  ;;  %700 = vrot.lane.b32.xlu0 %v626_v32, %s1618_s1 }
 0x8da   :  { %v554_v51 = vpack.c.bf16 %v553_v50, %v553_v50 }
 0x8dc   :  { %628 = vrot.lane.b32.xlu2 %v554_v51, %s1618_s1 }
 0x936   :  { %v629_v52 = vpop.permute.xlu2 %628 }
 0x937   :  { %1350 = vmatmul.msk.bf16.vlgmr.msra.gmra.mxu3 %vm227_vm6, %v629_v52  ;;  %1352 = vmatmul.msk.bf16.vlgmr.msrb.gmra.mxu1 %vm227_vm6, %v629_v52 }
 0x938   :  { %954 = vmatpush.bf16.msra.mxu3 %v1698_v27  ;;  %1032 = vmatpush.bf16.msrb.mxu1 %v1696_v26 }
 0x93c   :  { %955 = vmatpush.bf16.msra.mxu3 %v1707_v29  ;;  %1033 = vmatpush.bf16.msrb.mxu1 %v1705_v28 }
 0x94a   :  { %v701_v53 = vpop.permute.xlu0 %700 }
 0x94b   :  { %1353 = vmatmul.msk.bf16.vlgmr.msrb.gmra.mxu2 %vm227_vm6, %v701_v53 }
 0x94c   :  { %1085 = vmatpush.bf16.msrb.mxu2 %v1698_v27 }
 0x950   :  { %1086 = vmatpush.bf16.msrb.mxu2 %v1707_v29 }
 0x9b4   :  { %v695_v54 = vpop.f32.mrf.mxu1 }
 0x9b5   :  { %v696_v28 = vadd.f32 %v1725_v39, %v695_v54 }
 0x9ba   :  { %v642_v57 = vpop.f32.mrf.mxu3 }
 0x9bb   :  { %v646_v58 = vadd.f32 %v642_v57, %v170_v56 }
 0x9bc   :  { %v697_v59 = vpop.f32.mrf.mxu1 }
 0x9bd   :  { %v1351_v60 = vmul.f32 -1.442695, %v646_v58 }
 0x9bf   :  { %1451 = vpow2.f32 %v1351_v60  ;;  %v171_v60 = vpop.f32.mrf.mxu0 }
 0x9c2   :  { %v644_v26 = vpop.f32.mrf.mxu3 }
 0x9c5   :  { %v1452_v61 = vpop.eup %1451 }
 0x9c6   :  { %v650_v62 = vadd.f32 1.0, %v1452_v61 }
 0x9c8   :  { %1453 = vrcp.f32 %v650_v62  ;;  %v662_v6 = vand.u32 2147483648, %v650_v62  ;;  %v660_v8 = vand.u32 2147483647, %v650_v62  ;;  %vm656_vm3 = vweird.f32 %v650_v62 }
 0x9ca   :  { %v663_v11 = vor.u32 1.1754944e-38, %v662_v6  ;;  %vm661_vm5 = vcmp.eq.f32.partialorder %v660_v8, 8.507059e+37 }
 0x9ce   :  { %v1454_v63 = vpop.eup %1453  ;;  %v714_v0 = vpop.f32.mrf.mxu2 }
 0x9cf   :  { %v652_v1 = vmul.f32 %v1454_v63, %v650_v62  ;;  %v718_v2 = vadd.f32 %v714_v0, %v696_v28  ;;  %vm657_vm2 = vweird.f32 %v1454_v63 }
 0x9d0   :  { %vm658_vm4 = vmor %vm656_vm3, %vm657_vm2 }
 0x9d1   :  { %v653_v4 = vsub.f32 1.0, %v652_v1  ;;  %v1354_v5 = vmul.f32 -1.442695, %v718_v2 }
 0x9d3   :  { %v654_v7 = vmul.f32 %v1454_v63, %v653_v4  ;;  %1455 = vpow2.f32 %v1354_v5 }
 0x9d5   :  { %v655_v9 = vadd.f32 %v1454_v63, %v654_v7 }
 0x9d6   :  { %v716_v10 = vpop.f32.mrf.mxu2 }
 0x9d7   :  { %v659_v12 = vsel %vm658_vm4, %v1454_v63, %v655_v9 }
 0x9d8   :  { %v664_v14 = vsel %vm661_vm5, %v663_v11, %v659_v12 }
 0x9d9   :  { %v1456_v16 = vpop.eup %1455  ;;  %v666_v17 = vmul.f32 %v1684_v15, %v664_v14 }
 0x9da   :  { %v722_v19 = vadd.f32 1.0, %v1456_v16 }
 0x9db   :  { %v667_v21 = vadd.f32 %v1686_v18, %v666_v17 }
 0x9dc   :  { %1457 = vrcp.f32 %v722_v19  ;;  %v734_v31 = vand.u32 2147483648, %v722_v19  ;;  %v732_v34 = vand.u32 2147483647, %v722_v19  ;;  %vm728_vm8 = vweird.f32 %v722_v19 }
 0x9dd   :  { %670 = vrot.lane.b32.xlu1 %v667_v21, %s1615_s13  ;;  %v668_v32 = vmul.f32 %v667_v21, %v1821_v44 }
 0x9de   :  { %v735_v35 = vor.u32 1.1754944e-38, %v734_v31  ;;  %vm733_vm10 = vcmp.eq.f32.partialorder %v732_v34, 8.507059e+37 }
 0x9e2   :  { %v1458_v22 = vpop.eup %1457 }
 0x9e3   :  { %v724_v23 = vmul.f32 %v1458_v22, %v722_v19  ;;  %vm729_vm7 = vweird.f32 %v1458_v22 }
 0x9e4   :  { %vm730_vm9 = vmor %vm728_vm8, %vm729_vm7 }
 0x9e5   :  { %v725_v24 = vsub.f32 1.0, %v724_v23 }
 0x9e7   :  { %v726_v33 = vmul.f32 %v1458_v22, %v725_v24 }
 0x9e9   :  { %v727_v13 = vadd.f32 %v1458_v22, %v726_v33 }
 0x9eb   :  { %v731_v37 = vsel %vm730_vm9, %v1458_v22, %v727_v13 }
 0x9ec   :  { %v736_v38 = vsel %vm733_vm10, %v735_v35, %v731_v37 }
 0x9ed   :  { %v738_v20 = vmul.f32 %v1684_v15, %v736_v38 }
 0x9ef   :  { %v739_v40 = vadd.f32 %v1686_v18, %v738_v20 }
 0x9f1   :  { %742 = vrot.lane.b32.xlu2 %v739_v40, %s1615_s13  ;;  %v740_v36 = vmul.f32 %v739_v40, %v1817_v41  ;;  %v1391_v41 = vld [vmem:[%s1968_s0 + $0x18] sm:$0xff] }
 0x9f2   :  { %1310 = vmatmul.msk.bf16.gmra.mxu0 %vm133_vm1, %v1391_v41 }
 0xa4b   :  { %v743_v42 = vpop.permute.xlu2 %742 }
 0xa4c   :  { %v745_v43 = vmul.f32 %v743_v42, %v739_v40 }
 0xa4e   :  { %747 = vrot.lane.b32.xlu1 %v745_v43, %s1618_s1 }
 0xa4f   :  { %v671_v45 = vpop.permute.xlu1 %670 }
 0xa50   :  { %v673_v46 = vmul.f32 %v671_v45, %v667_v21 }
 0xa52   :  { %675 = vrot.lane.b32.xlu0 %v673_v46, %s1618_s1 }
 0xa6f   :  { %v1876_v26 = vpop.f32.mrf.mxu0 }
 0xa77   :  { %v1878_v61 = vpop.f32.mrf.mxu0 }
 0xac0   :  { %v748_v47 = vpop.permute.xlu1 %747 }
 0xac1   :  { %v1852_v48 = vadd.f32 %v748_v47, %v740_v36 }
 0xac3   :  { %1459 = vtanh.f32 %v1852_v48 }
 0xac4   :  { %v676_v49 = vpop.permute.xlu0 %675 }
 0xac5   :  { %v1856_v50 = vadd.f32 %v676_v49, %v668_v32 }
 0xac7   :  { %1461 = vtanh.f32 %v1856_v50 }
 0xac9   :  { %v1460_v51 = vpop.eup %1459 }
 0xaca   :  { %753 = vrot.lane.b32.xlu0 %v1460_v51, %s1615_s13 }
 0xacd   :  { %v1462_v52 = vpop.eup %1461 }
 0xace   :  { %681 = vrot.lane.b32.xlu2 %v1462_v52, %s1615_s13 }
 0xb28   :  { %v682_v53 = vpop.permute.xlu2 %681 }
 0xb29   :  { %v684_v54 = vmul.f32 %v682_v53, %v667_v21 }
 0xb2b   :  { %v685_v44 = vpack.c.bf16 %v684_v54, %v684_v54 }
 0xb2d   :  { %759 = vrot.lane.b32.xlu1 %v685_v44, %s1618_s1 }
 0xb3c   :  { %v754_v55 = vpop.permute.xlu0 %753 }
 0xb3d   :  { %v756_v56 = vmul.f32 %v754_v55, %v739_v40 }
 0xb3f   :  { %v757_v57 = vpack.c.bf16 %v756_v56, %v756_v56 }
 0xb41   :  { %831 = vrot.lane.b32.xlu2 %v757_v57, %s1618_s1 }
 0xb9b   :  { %v832_v58 = vpop.permute.xlu2 %831 }
 0xb9c   :  { %1358 = vmatmul.msk.bf16.vlgmr.msra.gmra.mxu1 %vm227_vm6, %v832_v58 }
 0xb9d   :  { %1182 = vmatpush.bf16.msra.mxu1 %v1747_v25 }
 0xb9f   :  { %v760_v59 = vpop.permute.xlu1 %759 }
 0xba0   :  { %1355 = vmatmul.msk.bf16.vlgmr.msrb.gmra.mxu3 %vm227_vm6, %v760_v59  ;;  %1357 = vmatmul.msk.bf16.vlgmr.msrb.gmra.mxu0 %vm227_vm6, %v760_v59 }
 0xba1   :  { %1104 = vmatpush.bf16.msrb.mxu3 %v1747_v25  ;;  %1163 = vmatpush.bf16.msrb.mxu0 %v1698_v27  ;;  %v172_v25 = vadd.f32 %v1681_v3, %v171_v60 }
 0xba2   :  { %1183 = vmatpush.bf16.msra.mxu1 %v1754_v30 }
 0xba5   :  { %1105 = vmatpush.bf16.msrb.mxu3 %v1754_v30  ;;  %1164 = vmatpush.bf16.msrb.mxu0 %v1707_v29 }
 0xc19   :  { %v845_v62 = vpop.f32.mrf.mxu1 }
 0xc1d   :  { %v826_v28 = vpop.f32.mrf.mxu0 }
 0xc1e   :  { %v827_v63 = vadd.f32 %v1725_v39, %v826_v28  ;;  %v1905_v28 = vld [vmem:[#allocation5] ss:$0 sm:$0xff] }
 0xc20   :  { %v849_v0 = vadd.f32 %v845_v62, %v827_v63  ;;  %v175_v63 = vadd.f32 %v1905_v28, %v1876_v26 }
 0xc21   :  { %v847_v1 = vpop.f32.mrf.mxu1 }
 0xc22   :  { %v1359_v27 = vmul.f32 -1.442695, %v849_v0 }
 0xc23   :  { %v773_v2 = vpop.f32.mrf.mxu3 }
 0xc24   :  { %1463 = vpow2.f32 %v1359_v27  ;;  %v777_v4 = vadd.f32 %v773_v2, %v172_v25 }
 0xc25   :  { %v828_v30 = vpop.f32.mrf.mxu0 }
 0xc26   :  { %v1356_v5 = vmul.f32 -1.442695, %v777_v4 }
 0xc28   :  { %1465 = vpow2.f32 %v1356_v5 }
 0xc2a   :  { %v1464_v29 = vpop.eup %1463 }
 0xc2b   :  { %v853_v6 = vadd.f32 1.0, %v1464_v29  ;;  %v775_v7 = vpop.f32.mrf.mxu3 }
 0xc2d   :  { %1467 = vrcp.f32 %v853_v6  ;;  %v863_v16 = vand.u32 2147483647, %v853_v6  ;;  %v865_v3 = vand.u32 2147483648, %v853_v6  ;;  %vm859_vm11 = vweird.f32 %v853_v6 }
 0xc2e   :  { %v1466_v8 = vpop.eup %1465 }
 0xc2f   :  { %v781_v9 = vadd.f32 1.0, %v1466_v8  ;;  %vm864_vm13 = vcmp.eq.f32.partialorder %v863_v16, 8.507059e+37  ;;  %v866_v23 = vor.u32 1.1754944e-38, %v865_v3 }
 0xc31   :  { %1469 = vrcp.f32 %v781_v9  ;;  %v793_v24 = vand.u32 2147483648, %v781_v9  ;;  %v791_v34 = vand.u32 2147483647, %v781_v9  ;;  %vm787_vm15 = vweird.f32 %v781_v9 }
 0xc33   :  { %v1468_v10 = vpop.eup %1467  ;;  %v794_v38 = vor.u32 1.1754944e-38, %v793_v24  ;;  %vm792_vm2 = vcmp.eq.f32.partialorder %v791_v34, 8.507059e+37 }
 0xc34   :  { %v855_v11 = vmul.f32 %v1468_v10, %v853_v6  ;;  %vm860_vm1 = vweird.f32 %v1468_v10 }
 0xc35   :  { %vm861_vm12 = vmor %vm859_vm11, %vm860_vm1 }
 0xc36   :  { %v856_v12 = vsub.f32 1.0, %v855_v11 }
 0xc37   :  { %v1470_v14 = vpop.eup %1469 }
 0xc38   :  { %v783_v17 = vmul.f32 %v1470_v14, %v781_v9  ;;  %v857_v19 = vmul.f32 %v1468_v10, %v856_v12  ;;  %vm788_vm14 = vweird.f32 %v1470_v14 }
 0xc39   :  { %vm789_vm0 = vmor %vm787_vm15, %vm788_vm14 }
 0xc3a   :  { %v784_v21 = vsub.f32 1.0, %v783_v17  ;;  %v858_v22 = vadd.f32 %v1468_v10, %v857_v19 }
 0xc3c   :  { %v785_v31 = vmul.f32 %v1470_v14, %v784_v21  ;;  %v862_v33 = vsel %vm861_vm12, %v1468_v10, %v858_v22 }
 0xc3d   :  { %v867_v13 = vsel %vm864_vm13, %v866_v23, %v862_v33 }
 0xc3e   :  { %v869_v35 = vmul.f32 %v1684_v15, %v867_v13  ;;  %v786_v37 = vadd.f32 %v1470_v14, %v785_v31 }
 0xc40   :  { %v870_v20 = vadd.f32 %v1686_v18, %v869_v35  ;;  %v790_v40 = vsel %vm789_vm0, %v1470_v14, %v786_v37  ;;  %v1910_v35 = vld [vmem:[#allocation5 + $0x2] ss:$0 sm:$0xff] }
 0xc41   :  { %v795_v42 = vsel %vm792_vm2, %v794_v38, %v790_v40  ;;  %v1913_v40 = vld [vmem:[#allocation5 + $0x3] ss:$0 sm:$0xff] }
 0xc42   :  { %873 = vrot.lane.b32.xlu1 %v870_v20, %s1615_s13  ;;  %v797_v43 = vmul.f32 %v1684_v15, %v795_v42 }
 0xc44   :  { %v798_v45 = vadd.f32 %v1686_v18, %v797_v43  ;;  %v871_v18 = vmul.f32 %v870_v20, %v1852_v48 }
 0xc46   :  { %801 = vrot.lane.b32.xlu0 %v798_v45, %s1615_s13  ;;  %v799_v49 = vmul.f32 %v798_v45, %v1856_v50 }
 0xcb4   :  { %v874_v46 = vpop.permute.xlu1 %873 }
 0xcb5   :  { %v876_v36 = vmul.f32 %v874_v46, %v870_v20 }
 0xcb7   :  { %878 = vrot.lane.b32.xlu0 %v876_v36, %s1618_s1 }
 0xcb8   :  { %v802_v47 = vpop.permute.xlu0 %801 }
 0xcb9   :  { %v804_v32 = vmul.f32 %v802_v47, %v798_v45 }
 0xcbb   :  { %806 = vrot.lane.b32.xlu2 %v804_v32, %s1618_s1 }
 0xd15   :  { %v807_v51 = vpop.permute.xlu2 %806 }
 0xd16   :  { %v1891_v52 = vadd.f32 %v807_v51, %v799_v49 }
 0xd18   :  { %1471 = vtanh.f32 %v1891_v52 }
 0xd1e   :  { %v1472_v15 = vpop.eup %1471 }
 0xd1f   :  { %812 = vrot.lane.b32.xlu1 %v1472_v15, %s1615_s13 }
 0xd29   :  { %v879_v41 = vpop.permute.xlu0 %878 }
 0xd2a   :  { %v1896_v53 = vadd.f32 %v879_v41, %v871_v18 }
 0xd2c   :  { %1473 = vtanh.f32 %v1896_v53 }
 0xd32   :  { %v1474_v54 = vpop.eup %1473 }
 0xd33   :  { %884 = vrot.lane.b32.xlu2 %v1474_v54, %s1615_s13 }
 0xd8d   :  { %v885_v44 = vpop.permute.xlu2 %884 }
 0xd8e   :  { %v887_v50 = vmul.f32 %v885_v44, %v870_v20 }
 0xd90   :  { %v888_v55 = vpack.c.bf16 %v887_v50, %v887_v50 }
 0xd91   :  { %v813_v56 = vpop.permute.xlu1 %812 }
 0xd92   :  { %v815_v57 = vmul.f32 %v813_v56, %v798_v45  ;;  %962 = vrot.lane.b32.xlu1 %v888_v55, %s1618_s1 }
 0xd94   :  { %v816_v58 = vpack.c.bf16 %v815_v57, %v815_v57 }
 0xd96   :  { %890 = vrot.lane.b32.xlu0 %v816_v58, %s1618_s1 }
 0xe04   :  { %v963_v59 = vpop.permute.xlu1 %962 }
 0xe05   :  { %1363 = vmatmul.msk.bf16.vlgmr.msra.gmra.mxu0 %vm227_vm6, %v963_v59 }
 0xe08   :  { %v891_v48 = vpop.permute.xlu0 %890 }
 0xe09   :  { %1360 = vmatmul.msk.bf16.vlgmr.msra.gmra.mxu2 %vm227_vm6, %v891_v48  ;;  %1362 = vmatmul.msk.bf16.vlgmr.msra.gmra.mxu3 %vm227_vm6, %v891_v48 }
 0xe82   :  { %v976_v60 = vpop.f32.mrf.mxu0 }
 0xe8a   :  { %v978_v62 = vpop.f32.mrf.mxu0 }
 0xe8c   :  { %v904_v0 = vpop.f32.mrf.mxu2  ;;  %v957_v1 = vpop.f32.mrf.mxu3 }
 0xe8d   :  { %v908_v25 = vadd.f32 %v904_v0, %v175_v63  ;;  %v958_v27 = vadd.f32 %v1725_v39, %v957_v1 }
 0xe8f   :  { %v1361_v2 = vmul.f32 -1.442695, %v908_v25  ;;  %v980_v4 = vadd.f32 %v976_v60, %v958_v27  ;;  %v177_v60 = vadd.f32 %v1905_v28, %v1878_v61 }
 0xe91   :  { %1475 = vpow2.f32 %v1361_v2  ;;  %v1364_v30 = vmul.f32 -1.442695, %v980_v4 }
 0xe93   :  { %1477 = vpow2.f32 %v1364_v30 }
 0xe94   :  { %v906_v5 = vpop.f32.mrf.mxu2  ;;  %v959_v29 = vpop.f32.mrf.mxu3 }
 0xe97   :  { %v1476_v6 = vpop.eup %1475 }
 0xe98   :  { %v912_v7 = vadd.f32 1.0, %v1476_v6 }
 0xe99   :  { %v1478_v8 = vpop.eup %1477 }
 0xe9a   :  { %1479 = vrcp.f32 %v912_v7  ;;  %v984_v9 = vadd.f32 1.0, %v1478_v8  ;;  %v924_v16 = vand.u32 2147483648, %v912_v7  ;;  %v922_v17 = vand.u32 2147483647, %v912_v7 }
 0xe9b   :  { %vm918_vm4 = vweird.f32 %v912_v7 }
 0xe9c   :  { %1481 = vrcp.f32 %v984_v9  ;;  %v996_v19 = vand.u32 2147483648, %v984_v9  ;;  %v994_v23 = vand.u32 2147483647, %v984_v9  ;;  %v925_v24 = vor.u32 1.1754944e-38, %v924_v16 }
 0xe9d   :  { %vm923_vm8 = vcmp.eq.f32.partialorder %v922_v17, 8.507059e+37  ;;  %vm990_vm9 = vweird.f32 %v984_v9 }
 0xe9e   :  { %v997_v13 = vor.u32 1.1754944e-38, %v996_v19  ;;  %vm995_vm1 = vcmp.eq.f32.partialorder %v994_v23, 8.507059e+37 }
 0xea0   :  { %v1480_v10 = vpop.eup %1479 }
 0xea1   :  { %v914_v26 = vmul.f32 %v1480_v10, %v912_v7  ;;  %vm919_vm3 = vweird.f32 %v1480_v10 }
 0xea2   :  { %v1482_v11 = vpop.eup %1481  ;;  %vm920_vm7 = vmor %vm918_vm4, %vm919_vm3 }
 0xea3   :  { %v915_v12 = vsub.f32 1.0, %v914_v26  ;;  %v986_v14 = vmul.f32 %v1482_v11, %v984_v9  ;;  %vm991_vm5 = vweird.f32 %v1482_v11  ;;  %v1508_v26 = vld [vmem:[#allocation5 + $0x1] ss:$0 sm:$0xff] }
 0xea4   :  { %vm992_vm10 = vmor %vm990_vm9, %vm991_vm5 }
 0xea5   :  { %v916_v39 = vmul.f32 %v1480_v10, %v915_v12  ;;  %v987_v3 = vsub.f32 1.0, %v986_v14 }
 0xea7   :  { %v917_v21 = vadd.f32 %v1480_v10, %v916_v39  ;;  %v988_v22 = vmul.f32 %v1482_v11, %v987_v3 }
 0xea9   :  { %v921_v31 = vsel %vm920_vm7, %v1480_v10, %v917_v21  ;;  %v989_v33 = vadd.f32 %v1482_v11, %v988_v22 }
 0xeaa   :  { %v926_v34 = vsel %vm923_vm8, %v925_v24, %v921_v31 }
 0xeab   :  { %v928_v37 = vmul.f32 %v1910_v35, %v926_v34  ;;  %v993_v38 = vsel %vm992_vm10, %v1482_v11, %v989_v33 }
 0xeac   :  { %v998_v20 = vsel %vm995_vm1, %v997_v13, %v993_v38 }
 0xead   :  { %v929_v42 = vadd.f32 %v1913_v40, %v928_v37  ;;  %v1000_v43 = vmul.f32 %v1910_v35, %v998_v20 }
 0xeaf   :  { %932 = vrot.lane.b32.xlu2 %v929_v42, %s1615_s13  ;;  %v1001_v45 = vadd.f32 %v1913_v40, %v1000_v43  ;;  %v930_v49 = vmul.f32 %v929_v42, %v1891_v52 }
 0xeb1   :  { %1004 = vrot.lane.b32.xlu0 %v1001_v45, %s1615_s13  ;;  %v1002_v18 = vmul.f32 %v1001_v45, %v1896_v53 }
 0xf09   :  { %v933_v46 = vpop.permute.xlu2 %932 }
 0xf0a   :  { %v935_v36 = vmul.f32 %v933_v46, %v929_v42 }
 0xf0c   :  { %937 = vrot.lane.b32.xlu1 %v935_v36, %s1618_s1 }
 0xf23   :  { %v1005_v47 = vpop.permute.xlu0 %1004 }
 0xf24   :  { %v1007_v32 = vmul.f32 %v1005_v47, %v1001_v45 }
 0xf26   :  { %1009 = vrot.lane.b32.xlu2 %v1007_v32, %s1618_s1 }
 0xf7e   :  { %v938_v51 = vpop.permute.xlu1 %937 }
 0xf7f   :  { %v1923_v15 = vadd.f32 %v938_v51, %v930_v49 }
 0xf80   :  { %v1010_v41 = vpop.permute.xlu2 %1009 }
 0xf81   :  { %1483 = vtanh.f32 %v1923_v15  ;;  %v1927_v54 = vadd.f32 %v1010_v41, %v1002_v18 }
 0xf83   :  { %1485 = vtanh.f32 %v1927_v54 }
 0xf87   :  { %v1484_v44 = vpop.eup %1483 }
 0xf88   :  { %943 = vrot.lane.b32.xlu0 %v1484_v44, %s1615_s13 }
 0xf89   :  { %v1486_v50 = vpop.eup %1485 }
 0xf8a   :  { %1015 = vrot.lane.b32.xlu1 %v1486_v50, %s1615_s13 }
 0xffa   :  { %v944_v55 = vpop.permute.xlu0 %943 }
 0xffb   :  { %v946_v52 = vmul.f32 %v944_v55, %v929_v42 }
 0xffc   :  { %v1016_v56 = vpop.permute.xlu1 %1015 }
 0xffd   :  { %v947_v57 = vpack.c.bf16 %v946_v52, %v946_v52  ;;  %v1018_v58 = vmul.f32 %v1016_v56, %v1001_v45 }
 0xfff   :  { %v1019_v59 = vpack.c.bf16 %v1018_v58, %v1018_v58  ;;  %1021 = vrot.lane.b32.xlu2 %v947_v57, %s1618_s1 }
0x1001   :  { %1093 = vrot.lane.b32.xlu0 %v1019_v59, %s1618_s1 }
0x1059   :  { %v1022_v53 = vpop.permute.xlu2 %1021 }
0x105a   :  { %1365 = vmatmul.msk.bf16.vlgmr.msrb.gmra.mxu1 %vm227_vm6, %v1022_v53  ;;  %1367 = vmatmul.msk.bf16.vlgmr.msrb.gmra.mxu2 %vm227_vm6, %v1022_v53 }
0x1073   :  { %v1094_v48 = vpop.permute.xlu0 %1093 }
0x1074   :  { %1368 = vmatmul.msk.bf16.vlgmr.msrb.gmra.mxu3 %vm227_vm6, %v1094_v48 }
0x10d7   :  { %v1035_v62 = vpop.f32.mrf.mxu1 }
0x10d8   :  { %v1039_v63 = vadd.f32 %v1035_v62, %v177_v60 }
0x10da   :  { %v1366_v0 = vmul.f32 -1.442695, %v1039_v63 }
0x10dc   :  { %1487 = vpow2.f32 %v1366_v0 }
0x10dd   :  { %v1088_v1 = vpop.f32.mrf.mxu2 }
0x10de   :  { %v1089_v11 = vadd.f32 %v1508_v26, %v1088_v1 }
0x10df   :  { %v1037_v25 = vpop.f32.mrf.mxu1 }
0x10e2   :  { %v1488_v27 = vpop.eup %1487 }
0x10e3   :  { %v1043_v2 = vadd.f32 1.0, %v1488_v27 }
0x10e5   :  { %1489 = vrcp.f32 %v1043_v2  ;;  %v1090_v4 = vpop.f32.mrf.mxu2  ;;  %v1055_v6 = vand.u32 2147483648, %v1043_v2  ;;  %v1053_v8 = vand.u32 2147483647, %v1043_v2  ;;  %vm1049_vm12 = vweird.f32 %v1043_v2 }
0x10e7   :  { %v1056_v61 = vor.u32 1.1754944e-38, %v1055_v6  ;;  %vm1054_vm14 = vcmp.eq.f32.partialorder %v1053_v8, 8.507059e+37 }
0x10eb   :  { %v1490_v30 = vpop.eup %1489 }
0x10ec   :  { %v1045_v5 = vmul.f32 %v1490_v30, %v1043_v2  ;;  %vm1050_vm11 = vweird.f32 %v1490_v30 }
0x10ed   :  { %vm1051_vm13 = vmor %vm1049_vm12, %vm1050_vm11 }
0x10ee   :  { %v1046_v29 = vsub.f32 1.0, %v1045_v5 }
0x10f0   :  { %v1047_v7 = vmul.f32 %v1490_v30, %v1046_v29 }
0x10f2   :  { %v1048_v9 = vadd.f32 %v1490_v30, %v1047_v7 }
0x10f4   :  { %v1052_v28 = vsel %vm1051_vm13, %v1490_v30, %v1048_v9 }
0x10f5   :  { %v1057_v10 = vsel %vm1054_vm14, %v1056_v61, %v1052_v28 }
0x10f6   :  { %v1059_v12 = vmul.f32 %v1910_v35, %v1057_v10 }
0x10f7   :  { %v1107_v14 = vpop.f32.mrf.mxu3 }
0x10f8   :  { %v1111_v16 = vadd.f32 %v1107_v14, %v1089_v11  ;;  %v1060_v39 = vadd.f32 %v1913_v40, %v1059_v12 }
0x10fa   :  { %v1369_v3 = vmul.f32 -1.442695, %v1111_v16  ;;  %1063 = vrot.lane.b32.xlu1 %v1060_v39, %s1615_s13  ;;  %v1061_v32 = vmul.f32 %v1060_v39, %v1923_v15 }
0x10fc   :  { %1491 = vpow2.f32 %v1369_v3 }
0x10ff   :  { %v1109_v17 = vpop.f32.mrf.mxu3 }
0x1100   :  { %v1393_v17 = vld [vmem:[#allocation7 + $0x8] sm:$0xff] }
0x1101   :  { %1261 = vmatpush.bf16.msra.mxu2 %v1393_v17 }
0x1102   :  { %v1492_v19 = vpop.eup %1491 }
0x1103   :  { %v1115_v21 = vadd.f32 1.0, %v1492_v19  ;;  %v1392_v19 = vld [vmem:[#allocation7] sm:$0xff] }
0x1105   :  { %1493 = vrcp.f32 %v1115_v21  ;;  %v1127_v31 = vand.u32 2147483648, %v1115_v21  ;;  %v1125_v34 = vand.u32 2147483647, %v1115_v21  ;;  %vm1121_vm0 = vweird.f32 %v1115_v21  ;;  %1262 = vmatpush.bf16.msra.mxu2 %v1392_v19 }
0x1107   :  { %v1128_v37 = vor.u32 1.1754944e-38, %v1127_v31  ;;  %vm1126_vm3 = vcmp.eq.f32.partialorder %v1125_v34, 8.507059e+37 }
0x110b   :  { %v1494_v22 = vpop.eup %1493 }
0x110c   :  { %v1117_v23 = vmul.f32 %v1494_v22, %v1115_v21  ;;  %vm1122_vm15 = vweird.f32 %v1494_v22 }
0x110d   :  { %vm1123_vm2 = vmor %vm1121_vm0, %vm1122_vm15 }
0x110e   :  { %v1118_v24 = vsub.f32 1.0, %v1117_v23  ;;  %v1408_v23 = vld [vmem:[%s1974_s6] ss:$0 sm:$0xff] }
0x1110   :  { %v1119_v33 = vmul.f32 %v1494_v22, %v1118_v24 }
0x1112   :  { %v1120_v13 = vadd.f32 %v1494_v22, %v1119_v33 }
0x1114   :  { %v1124_v38 = vsel %vm1123_vm2, %v1494_v22, %v1120_v13 }
0x1115   :  { %v1129_v20 = vsel %vm1126_vm3, %v1128_v37, %v1124_v38 }
0x1116   :  { %v1131_v42 = vmul.f32 %v1910_v35, %v1129_v20 }
0x1118   :  { %v1132_v43 = vadd.f32 %v1913_v40, %v1131_v42 }
0x111a   :  { %1135 = vrot.lane.b32.xlu2 %v1132_v43, %s1615_s13  ;;  %v1133_v18 = vmul.f32 %v1132_v43, %v1927_v54 }
0x116c   :  { %v1064_v45 = vpop.permute.xlu1 %1063 }
0x116d   :  { %v1066_v46 = vmul.f32 %v1064_v45, %v1060_v39 }
0x116f   :  { %1068 = vrot.lane.b32.xlu0 %v1066_v46, %s1618_s1 }
0x1174   :  { %v1136_v36 = vpop.permute.xlu2 %1135 }
0x1175   :  { %v1138_v47 = vmul.f32 %v1136_v36, %v1132_v43 }
0x1177   :  { %1140 = vrot.lane.b32.xlu1 %v1138_v47, %s1618_s1 }
0x11e1   :  { %v1069_v49 = vpop.permute.xlu0 %1068 }
0x11e2   :  { %v1071_v51 = vadd.f32 %v1069_v49, %v1061_v32 }
0x11e4   :  { %1495 = vtanh.f32 %v1071_v51 }
0x11e9   :  { %v1141_v41 = vpop.permute.xlu1 %1140 }
0x11ea   :  { %v1496_v44 = vpop.eup %1495  ;;  %v1143_v50 = vadd.f32 %v1141_v41, %v1133_v18 }
0x11eb   :  { %1074 = vrot.lane.b32.xlu2 %v1496_v44, %s1615_s13 }
0x11ec   :  { %1497 = vtanh.f32 %v1143_v50 }
0x11f2   :  { %v1498_v55 = vpop.eup %1497 }
0x11f3   :  { %1146 = vrot.lane.b32.xlu0 %v1498_v55, %s1615_s13 }
0x1245   :  { %v1075_v52 = vpop.permute.xlu2 %1074 }
0x1246   :  { %v1077_v56 = vmul.f32 %v1075_v52, %v1060_v39 }
0x1248   :  { %v1078_v57 = vpack.c.bf16 %v1077_v56, %v1077_v56 }
0x124a   :  { %1152 = vrot.lane.b32.xlu1 %v1078_v57, %s1618_s1 }
0x1265   :  { %v1147_v15 = vpop.permute.xlu0 %1146 }
0x1266   :  { %v1149_v58 = vmul.f32 %v1147_v15, %v1132_v43 }
0x1268   :  { %v1150_v59 = vpack.c.bf16 %v1149_v58, %v1149_v58 }
0x126a   :  { %1171 = vrot.lane.b32.xlu2 %v1150_v59, %s1618_s1 }
0x12bc   :  { %v1153_v54 = vpop.permute.xlu1 %1152 }
0x12bd   :  { %1370 = vmatmul.msk.bf16.vlgmr.msrb.gmra.mxu0 %vm227_vm6, %v1153_v54 }
0x12c4   :  { %v1172_v53 = vpop.permute.xlu2 %1171 }
0x12c5   :  { %1371 = vmatmul.msk.bf16.vlgmr.msra.gmra.mxu1 %vm227_vm6, %v1172_v53 }
0x133a   :  { %v1166_v48 = vpop.f32.mrf.mxu0 }
0x133b   :  { %v1167_v60 = vadd.f32 %v1508_v26, %v1166_v48 }
0x1342   :  { %v1168_v62 = vpop.f32.mrf.mxu0  ;;  %v1185_v63 = vpop.f32.mrf.mxu1 }
0x1343   :  { %v1189_v0 = vadd.f32 %v1185_v63, %v1167_v60 }
0x1345   :  { %v1372_v1 = vmul.f32 -1.442695, %v1189_v0 }
0x1347   :  { %1499 = vpow2.f32 %v1372_v1 }
0x134a   :  { %v1187_v25 = vpop.f32.mrf.mxu1 }
0x134d   :  { %v1500_v27 = vpop.eup %1499 }
0x134e   :  { %v1193_v2 = vadd.f32 1.0, %v1500_v27 }
0x1350   :  { %1501 = vrcp.f32 %v1193_v2  ;;  %v1205_v29 = vand.u32 2147483648, %v1193_v2  ;;  %v1203_v7 = vand.u32 2147483647, %v1193_v2  ;;  %vm1199_vm5 = vweird.f32 %v1193_v2 }
0x1352   :  { %v1206_v9 = vor.u32 1.1754944e-38, %v1205_v29  ;;  %vm1204_vm8 = vcmp.eq.f32.partialorder %v1203_v7, 8.507059e+37 }
0x1356   :  { %v1502_v4 = vpop.eup %1501 }
0x1357   :  { %v1195_v30 = vmul.f32 %v1502_v4, %v1193_v2  ;;  %vm1200_vm4 = vweird.f32 %v1502_v4 }
0x1358   :  { %vm1201_vm7 = vmor %vm1199_vm5, %vm1200_vm4 }
0x1359   :  { %v1196_v5 = vsub.f32 1.0, %v1195_v30 }
0x135b   :  { %v1197_v6 = vmul.f32 %v1502_v4, %v1196_v5 }
0x135d   :  { %v1198_v8 = vadd.f32 %v1502_v4, %v1197_v6 }
0x135f   :  { %v1202_v61 = vsel %vm1201_vm7, %v1502_v4, %v1198_v8 }
0x1360   :  { %v1207_v28 = vsel %vm1204_vm8, %v1206_v9, %v1202_v61 }
0x1361   :  { %v1209_v10 = vmul.f32 %v1910_v35, %v1207_v28 }
0x1363   :  { %v1210_v26 = vadd.f32 %v1913_v40, %v1209_v10 }
0x1365   :  { %1213 = vrot.lane.b32.xlu0 %v1210_v26, %s1615_s13  ;;  %v1211_v14 = vmul.f32 %v1210_v26, %v1143_v50 }
0x13d7   :  { %v1214_v11 = vpop.permute.xlu0 %1213 }
0x13d8   :  { %v1216_v12 = vmul.f32 %v1214_v11, %v1210_v26 }
0x13da   :  { %1218 = vrot.lane.b32.xlu1 %v1216_v12, %s1618_s1 }
0x144c   :  { %v1219_v16 = vpop.permute.xlu1 %1218 }
0x144d   :  { %v1221_v39 = vadd.f32 %v1219_v16, %v1211_v14 }
0x144f   :  { %1503 = vtanh.f32 %v1221_v39 }
0x1455   :  { %v1504_v3 = vpop.eup %1503 }
0x1456   :  { %1224 = vrot.lane.b32.xlu2 %v1504_v3, %s1615_s13 }
0x14b0   :  { %v1225_v35 = vpop.permute.xlu2 %1224 }
0x14b1   :  { %v1227_v21 = vmul.f32 %v1225_v35, %v1210_v26 }
0x14b3   :  { %v1228_v40 = vpack.c.bf16 %v1227_v21, %v1227_v21 }
0x14b5   :  { %1238 = vrot.lane.b32.xlu0 %v1228_v40, %s1618_s1 }
0x1527   :  { %v1239_v22 = vpop.permute.xlu0 %1238 }
0x1528   :  { %1381 = vmatmul.msk.bf16.vlgmr.msra.gmra.mxu2 %vm227_vm6, %v1239_v22 }
0x15ab   :  { %v1264_v24 = vpop.f32.mrf.mxu2 }
0x15ac   :  { %v1265_v31 = vadd.f32 %v1408_v23, %v1264_v24 }
0x15ae   :  { %1268 = vst [vmem:[#allocation8] sm:$0xff] %v1265_v31 }
0x15af   :  { %1279 = dma.vmem_to_hbm [thread:$0]  %s1275_s4, 128, %s1277_s16, [#allocation4]  }
0x15b3   :  { %v1266_v33 = vpop.f32.mrf.mxu2 }
0x15b4   :  { %1609 = dma.done.wait [#allocation4], 128  }
0x15b5   :  { %1610 = vsyncadd [#allocation4], 4294967168 }
0x15b6   :  { %1284 = vsyncpa [#allocation3], 1 }
0x15b7   :  { %1285 = vsyncpa [#allocation6], 1 }
0x15b8   :  { %1286 = vsyncpa [#allocation4], 1 }

</bundles_post_ra>
